<compile_context>
chip_gen: v6e
topology: v6e:2x2x1
jax: 0.10.0
libtpu: 0.0.40
codegen_flags: <defaults>
</compile_context>

<pallas_src>
import functools

import jax
import jax.numpy as jnp
import numpy as np
from jax import lax
from jax.experimental import pallas as pl
from jax.experimental.pallas import tpu as pltpu

HIDDEN = 256
IMG_DIM = 1000


def _cdiv(a, b):
    return -(-a // b)


def _round_up(x, m):
    return _cdiv(x, m) * m


def _balanced_tiles(n, max_tile, align):
    """Pick a tile size <= max_tile (multiple of `align`) with minimal padding."""
    n_aligned = _round_up(max(n, 1), align)
    ntiles = _cdiv(n_aligned, max_tile)
    tile = _round_up(_cdiv(n_aligned, ntiles), align)
    return tile, tile * ntiles


# ---------------------------------------------------------------------------
# One-time parameter preparation (hoisted out of the forward path):
# bf16 copies of all big matmul weights, vocab-padded w4/b4.
# ---------------------------------------------------------------------------
def prepare_params(params, *, tile_v=2048):
    bf16 = jnp.bfloat16
    V = params["cw4"].shape[1]
    tv, Vp = _balanced_tiles(V, tile_v, 128)

    prep = dict(params)
    prep.update(
        bw1=params["bw1"].astype(bf16),
        bw2=params["bw2"].astype(bf16),
        w_ih=params["w_ih"].astype(bf16),
        w_hh=params["w_hh"].astype(bf16),
        cw1=params["cw1"].astype(bf16),
        cw2=params["cw2"].astype(bf16),
        cw3=params["cw3"].astype(bf16),
        cw4=jnp.pad(params["cw4"], ((0, 0), (0, Vp - V))).astype(bf16),
        cb4=jnp.pad(params["cb4"], ((0, Vp - V),)),
        num_vocab=V,
        vocab_tile=tv,
        vocab_padded=Vp,
    )
    return prep


# ---------------------------------------------------------------------------
# Kernel 1: bottleneck MLP  (Linear(1000,512) -> ReLU -> Linear(512,256) -> ReLU)
# Tiny (~1.3 MiB of weights); single grid step, bf16 operands / f32 accumulate.
# ---------------------------------------------------------------------------
def _bottleneck_kernel(x_ref, w1_ref, b1_ref, w2_ref, b2_ref, o_ref):
    h = jnp.dot(x_ref[...], w1_ref[...], preferred_element_type=jnp.float32)
    h = jnp.maximum(h + b1_ref[...], 0.0)
    o = jnp.dot(h.astype(jnp.bfloat16), w2_ref[...],
                preferred_element_type=jnp.float32)
    o_ref[...] = jnp.maximum(o + b2_ref[...], 0.0)


def bottleneck(x_bf16, w1, b1, w2, b2):
    Bp = x_bf16.shape[0]
    return pl.pallas_call(
        _bottleneck_kernel,
        out_shape=jax.ShapeDtypeStruct((Bp, HIDDEN), jnp.float32),
        grid=(1,),
        in_specs=[
            pl.BlockSpec(x_bf16.shape, lambda i: (0, 0)),
            pl.BlockSpec(w1.shape, lambda i: (0, 0)),
            pl.BlockSpec((1, b1.shape[0]), lambda i: (0, 0)),
            pl.BlockSpec(w2.shape, lambda i: (0, 0)),
            pl.BlockSpec((1, b2.shape[0]), lambda i: (0, 0)),
        ],
        out_specs=pl.BlockSpec((Bp, HIDDEN), lambda i: (0, 0)),
        compiler_params=pltpu.CompilerParams(
            dimension_semantics=("arbitrary",), vmem_limit_bytes=32 << 20),
    )(x_bf16, w1, b1.reshape(1, -1), w2, b2.reshape(1, -1))


# ---------------------------------------------------------------------------
# Kernel 2: single-layer LSTM recurrence, Tt timesteps per grid step.
#   * x is flattened time-major [Tp*Bp, 256] bf16; each grid step gets a
#     (Tt*Bp, 256) block and computes the whole block's input gates
#     gx = x @ W_ih + (b_ih + b_hh) in one matmul (fused, no HBM round trip).
#   * h/c carry in f32 VMEM scratch across grid steps; h0 = c0 = bottleneck(img).
#   * Gate activations in bf16 (f32 carried state); PyTorch gate order i,f,g,o.
#   * Per-step hidden states land in an f32 scratch slab and are written once
#     per grid step as a lane-dense bf16 output block.
# ---------------------------------------------------------------------------
def _lstm_kernel(x_ref, h0_ref, wih_ref, whh_ref, b_ref, o_ref,
                 h_sc, c_sc, y_sc, gx_sc, *, tt, bp):
    @pl.when(pl.program_id(0) == 0)
    def _():
        h_sc[...] = h0_ref[...]
        c_sc[...] = h0_ref[...]

    # fused input-gate matmul for the whole Tt block (LSTM bias folded in)
    gx_sc[...] = (jnp.dot(x_ref[...], wih_ref[...],
                          preferred_element_type=jnp.float32) + b_ref[...])

    h = h_sc[...]
    c = c_sc[...]
    for s in range(tt):                       # unrolled: tt is a Python int
        g = gx_sc[s * bp:(s + 1) * bp, :] + jnp.dot(
            h.astype(jnp.bfloat16), whh_ref[...],
            preferred_element_type=jnp.float32)
        gb = g.astype(jnp.bfloat16)           # bf16 EUP on v6e/v7x (~2x)
        i_g = jax.nn.sigmoid(gb[:, 0 * HIDDEN:1 * HIDDEN]).astype(jnp.float32)
        f_g = jax.nn.sigmoid(gb[:, 1 * HIDDEN:2 * HIDDEN]).astype(jnp.float32)
        g_g = jnp.tanh(gb[:, 2 * HIDDEN:3 * HIDDEN]).astype(jnp.float32)
        o_g = jax.nn.sigmoid(gb[:, 3 * HIDDEN:4 * HIDDEN]).astype(jnp.float32)
        c = f_g * c + i_g * g_g
        h = o_g * jnp.tanh(c.astype(jnp.bfloat16)).astype(jnp.float32)
        y_sc[s * bp:(s + 1) * bp, :] = h      # aligned (8,128)-tile stores
    h_sc[...] = h
    c_sc[...] = c
    o_ref[...] = y_sc[...].astype(o_ref.dtype)


def lstm(x2d, h0, w_ih, w_hh, b, *, tt, bp):
    TpBp, H = x2d.shape
    G = w_ih.shape[1]
    ntt = TpBp // (tt * bp)
    kern = functools.partial(_lstm_kernel, tt=tt, bp=bp)
    return pl.pallas_call(
        kern,
        out_shape=jax.ShapeDtypeStruct((TpBp, H), jnp.bfloat16),
        grid=(ntt,),
        in_specs=[
            pl.BlockSpec((tt * bp, H), lambda t: (t, 0)),
            pl.BlockSpec((bp, H), lambda t: (0, 0)),
            pl.BlockSpec((H, G), lambda t: (0, 0)),
            pl.BlockSpec((H, G), lambda t: (0, 0)),
            pl.BlockSpec((1, G), lambda t: (0, 0)),
        ],
        out_specs=pl.BlockSpec((tt * bp, H), lambda t: (t, 0)),
        scratch_shapes=[
            pltpu.VMEM((bp, H), jnp.float32),          # h carry
            pltpu.VMEM((bp, H), jnp.float32),          # c carry
            pltpu.VMEM((tt * bp, H), jnp.float32),     # block of hidden states
            pltpu.VMEM((tt * bp, G), jnp.float32),     # block of input gates
        ],
        compiler_params=pltpu.CompilerParams(
            dimension_semantics=("arbitrary",), vmem_limit_bytes=32 << 20),
    )(x2d, h0, w_ih, w_hh, b.reshape(1, -1))


# ---------------------------------------------------------------------------
# Kernel 3a: classifier hidden stack
#   Linear(256,512)+ReLU -> Linear(512,1024)+ReLU -> Linear(1024,2048)+ReLU
# Row-tiled (parallel); w1..w3 resident; bf16 output for stage B.
# ---------------------------------------------------------------------------
def _cls_hidden_kernel(x_ref, w1_ref, b1_ref, w2_ref, b2_ref, w3_ref, b3_ref,
                       o_ref):
    h = jnp.maximum(
        jnp.dot(x_ref[...], w1_ref[...], preferred_element_type=jnp.float32)
        + b1_ref[...], 0.0)
    h = jnp.maximum(
        jnp.dot(h.astype(jnp.bfloat16), w2_ref[...],
                preferred_element_type=jnp.float32) + b2_ref[...], 0.0)
    h = jnp.maximum(
        jnp.dot(h.astype(jnp.bfloat16), w3_ref[...],
                preferred_element_type=jnp.float32) + b3_ref[...], 0.0)
    o_ref[...] = h.astype(o_ref.dtype)


def classifier_hidden(x_p, tm, w1, b1, w2, b2, w3, b3):
    Np = x_p.shape[0]
    return pl.pallas_call(
        _cls_hidden_kernel,
        out_shape=jax.ShapeDtypeStruct((Np, 2048), jnp.bfloat16),
        grid=(Np // tm,),
        in_specs=[
            pl.BlockSpec((tm, HIDDEN), lambda i: (i, 0)),
            pl.BlockSpec((HIDDEN, 512), lambda i: (0, 0)),
            pl.BlockSpec((1, 512), lambda i: (0, 0)),
            pl.BlockSpec((512, 1024), lambda i: (0, 0)),
            pl.BlockSpec((1, 1024), lambda i: (0, 0)),
            pl.BlockSpec((1024, 2048), lambda i: (0, 0)),
            pl.BlockSpec((1, 2048), lambda i: (0, 0)),
        ],
        out_specs=pl.BlockSpec((tm, 2048), lambda i: (i, 0)),
        compiler_params=pltpu.CompilerParams(
            dimension_semantics=("parallel",), vmem_limit_bytes=48 << 20),
    )(x_p, w1, b1.reshape(1, -1), w2, b2.reshape(1, -1), w3, b3.reshape(1, -1))


# ---------------------------------------------------------------------------
# Kernel 3b: classifier logits  Linear(2048, Vp)
# Grid = (vocab tiles OUTER, row tiles INNER): the (2048, tv) w4 slab changes
# only when the outer index changes, so each vocab tile of w4 is DMA'd exactly
# once per forward; row tiles of the bf16 intermediate are streamed inner.
# ---------------------------------------------------------------------------
def _cls_logits_kernel(h_ref, w4_ref, b4_ref, o_ref):
    o_ref[...] = (jnp.dot(h_ref[...], w4_ref[...],
                          preferred_element_type=jnp.float32) + b4_ref[...])


def classifier_logits(h_p, tm, tv, w4_p, b4_p):
    Np = h_p.shape[0]
    Vp = w4_p.shape[1]
    return pl.pallas_call(
        _cls_logits_kernel,
        out_shape=jax.ShapeDtypeStruct((Np, Vp), jnp.float32),
        grid=(Vp // tv, Np // tm),              # vocab outer, rows inner
        in_specs=[
            pl.BlockSpec((tm, 2048), lambda v, i: (i, 0)),
            pl.BlockSpec((2048, tv), lambda v, i: (0, v)),
            pl.BlockSpec((1, tv), lambda v, i: (0, v)),
        ],
        out_specs=pl.BlockSpec((tm, tv), lambda v, i: (i, v)),
        compiler_params=pltpu.CompilerParams(
            dimension_semantics=("parallel", "parallel"),
            vmem_limit_bytes=48 << 20),
    )(h_p, w4_p, b4_p.reshape(1, -1))


# ---------------------------------------------------------------------------
# Full forward (prediction=False branch of RNNDecoder.forward).
# Expects params returned by prepare_params() (weights pre-cast / pre-padded).
# ---------------------------------------------------------------------------
def rnn_decoder_forward(tokens, img_embeded, params):
    p = params
    B, T = tokens.shape
    Bp = _round_up(B, 8)                      # pad batch to f32 sublane count
    V, tv = p["num_vocab"], p["vocab_tile"]
    bf16 = jnp.bfloat16

    # bottleneck (bf16 MXU operands) -> h0 = c0
    img_p = jnp.pad(img_embeded, ((0, Bp - B), (0, 0))).astype(bf16)
    h0 = bottleneck(img_p, p["bw1"], p["bb1"], p["bw2"], p["bb2"])   # [Bp,256] f32

    # timestep blocking for the LSTM (Tt steps per grid iteration)
    tt_max = max(1, min(32, 512 // Bp))
    ntt = _cdiv(T, tt_max)
    tt = _cdiv(T, ntt)
    Tp = ntt * tt

    # embedding lookup in time-major order; cast AFTER the gather
    tok_tm = jnp.pad(jnp.transpose(tokens), ((0, Tp - T), (0, Bp - B)))  # [Tp,Bp]
    x_tm = jnp.take(p["emb"], tok_tm, axis=0).astype(bf16)              # [Tp,Bp,256]
    x2d = x_tm.reshape(Tp * Bp, HIDDEN)

    # recurrent LSTM (fused input-gate matmul, Tt steps per grid step)
    h_seq = lstm(x2d, h0, p["w_ih"], p["w_hh"], p["b_lstm"],
                 tt=tt, bp=Bp)                                          # [Tp*Bp,256] bf16

    # -> batch-major rows for the classifier (bf16 transpose in XLA)
    h_bm = jnp.transpose(h_seq.reshape(Tp, Bp, HIDDEN)[:T, :B],
                         (1, 0, 2)).reshape(B * T, HIDDEN)

    # classifier: row-tiled hidden stack, then vocab-resident logits matmul
    N = B * T
    tm, Np = _balanced_tiles(N, 512, 8)
    h_p = h_bm if Np == N else jnp.pad(h_bm, ((0, Np - N), (0, 0)))
    hid = classifier_hidden(h_p, tm, p["cw1"], p["cb1"], p["cw2"], p["cb2"],
                            p["cw3"], p["cb3"])                         # [Np,2048] bf16
    logits = classifier_logits(hid, tm, tv, p["cw4"], p["cb4"])         # [Np,Vp] f32
    return logits[:N, :V].reshape(B, T, V)


# ---------------------------------------------------------------------------
# Pure-JAX f32 reference for validation
# ---------------------------------------------------------------------------
def rnn_decoder_reference(tokens, img_embeded, params):
    p = params
    B, T = tokens.shape
    h = jax.nn.relu(img_embeded @ p["bw1"] + p["bb1"])
    h0 = jax.nn.relu(h @ p["bw2"] + p["bb2"])
    c0 = h0
    x_emb = jnp.take(p["emb"], tokens, axis=0)
    x_tm = jnp.transpose(x_emb, (1, 0, 2))

    def step(carry, xt):
        hh, cc = carry
        gates = xt @ p["w_ih"] + hh @ p["w_hh"] + p["b_lstm"]
        i_g = jax.nn.sigmoid(gates[:, 0 * HIDDEN:1 * HIDDEN])
        f_g = jax.nn.sigmoid(gates[:, 1 * HIDDEN:2 * HIDDEN])
        g_g = jnp.tanh(gates[:, 2 * HIDDEN:3 * HIDDEN])
        o_g = jax.nn.sigmoid(gates[:, 3 * HIDDEN:4 * HIDDEN])
        cc = f_g * cc + i_g * g_g
        hh = o_g * jnp.tanh(cc)
        return (hh, cc), hh

    _, ys = lax.scan(step, (h0, c0), x_tm)
    h_bf = jnp.transpose(ys, (1, 0, 2)).reshape(B * T, HIDDEN)
    z = jax.nn.relu(h_bf @ p["cw1"] + p["cb1"])
    z = jax.nn.relu(z @ p["cw2"] + p["cb2"])
    z = jax.nn.relu(z @ p["cw3"] + p["cb3"])
    z = z @ p["cw4"] + p["cb4"]
    return z.reshape(B, T, -1)


def make_params(key, num_vocab):
    ks = jax.random.split(key, 16)
    s = 0.05

    def w(k, shape):
        return (s * jax.random.normal(k, shape)).astype(jnp.float32)

    emb = w(ks[0], (num_vocab, HIDDEN))
    emb = emb.at[0].set(0.0)  # padding_idx=0
    return dict(
        bw1=w(ks[1], (IMG_DIM, 512)), bb1=w(ks[2], (512,)),
        bw2=w(ks[3], (512, HIDDEN)), bb2=w(ks[4], (HIDDEN,)),
        emb=emb,
        w_ih=w(ks[5], (HIDDEN, 4 * HIDDEN)),
        w_hh=w(ks[6], (HIDDEN, 4 * HIDDEN)),
        b_lstm=w(ks[7], (4 * HIDDEN,)),   # combined b_ih + b_hh
        cw1=w(ks[8], (HIDDEN, 512)), cb1=w(ks[9], (512,)),
        cw2=w(ks[10], (512, 1024)), cb2=w(ks[11], (1024,)),
        cw3=w(ks[12], (1024, 2048)), cb3=w(ks[13], (2048,)),
        cw4=w(ks[14], (2048, num_vocab)), cb4=w(ks[15], (num_vocab,)),
    )


if __name__ == "__main__":
    num_vocab = 100
    B, T = 2, 8

    key = jax.random.PRNGKey(0)
    k_tok, k_img, k_par = jax.random.split(key, 3)
    tokens = jax.random.randint(k_tok, (B, T), 0, num_vocab, dtype=jnp.int32)
    img_embeded = jax.random.normal(k_img, (B, IMG_DIM), dtype=jnp.float32)
    params = make_params(k_par, num_vocab)

    # one-time (hoisted) bf16 cast + vocab padding of the big weights
    prepared = prepare_params(params)

    out = jax.block_until_ready(rnn_decoder_forward(tokens, img_embeded, prepared))
    ref = jax.block_until_ready(rnn_decoder_reference(tokens, img_embeded, params))
    assert out.shape == (B, T, num_vocab), out.shape
    # bf16 matmul operands / bf16 gate activations (f32 accumulate) vs pure-f32 ref
    np.testing.assert_allclose(np.asarray(out), np.asarray(ref), rtol=2e-2, atol=4e-2)

    print("KERNEL_OK")
</pallas_src>

<mosaic_0001>
module attributes {stable_mosaic.version = 11 : i64} {
  func.func @_bottleneck_kernel(%arg0: i32, %arg1: memref<8x1000xbf16, #tpu.memory_space<vmem>>, %arg2: memref<1000x512xbf16, #tpu.memory_space<vmem>>, %arg3: memref<1x512xf32, #tpu.memory_space<vmem>>, %arg4: memref<512x256xbf16, #tpu.memory_space<vmem>>, %arg5: memref<1x256xf32, #tpu.memory_space<vmem>>, %arg6: memref<8x256xf32, #tpu.memory_space<vmem>>) attributes {dimension_semantics = [#tpu.dimension_semantics<arbitrary>], iteration_bounds = array<i64: 1>, scalar_prefetch = 0 : i64, scratch_operands = 0 : i64, tpu.core_type = #tpu.core_type<tc>, window_params = [{pipeline_mode = #tpu.pipeline_mode<synchronous>, transform_indices = @transform_0, window_bounds = array<i64: 8, 1000>}, {pipeline_mode = #tpu.pipeline_mode<synchronous>, transform_indices = @transform_1, window_bounds = array<i64: 1000, 512>}, {pipeline_mode = #tpu.pipeline_mode<synchronous>, transform_indices = @transform_2, window_bounds = array<i64: 1, 512>}, {pipeline_mode = #tpu.pipeline_mode<synchronous>, transform_indices = @transform_3, window_bounds = array<i64: 512, 256>}, {pipeline_mode = #tpu.pipeline_mode<synchronous>, transform_indices = @transform_4, window_bounds = array<i64: 1, 256>}, {pipeline_mode = #tpu.pipeline_mode<synchronous>, transform_indices = @transform_5, window_bounds = array<i64: 8, 256>}]} {
    %c0 = arith.constant 0 : index
    %c0_0 = arith.constant 0 : index
    %0 = vector.load %arg1[%c0, %c0_0] : memref<8x1000xbf16, #tpu.memory_space<vmem>>, vector<8x1000xbf16>
    %c0_1 = arith.constant 0 : index
    %c0_2 = arith.constant 0 : index
    %1 = vector.load %arg2[%c0_1, %c0_2] : memref<1000x512xbf16, #tpu.memory_space<vmem>>, vector<1000x512xbf16>
    %cst = arith.constant dense<0.000000e+00> : vector<8x512xf32>
    %2 = tpu.matmul %0, %1, %cst {dimension_numbers = #tpu.dot_dimension_numbers<[1], [0], [0], [1], [0, 0, 1, 1], [], []>} : vector<8x1000xbf16>, vector<1000x512xbf16>, vector<8x512xf32> -> vector<8x512xf32>
    %c0_3 = arith.constant 0 : index
    %c0_4 = arith.constant 0 : index
    %3 = vector.load %arg3[%c0_3, %c0_4] : memref<1x512xf32, #tpu.memory_space<vmem>>, vector<1x512xf32>
    %4 = vector.broadcast %3 : vector<1x512xf32> to vector<8x512xf32>
    %5 = arith.addf %2, %4 : vector<8x512xf32>
    %cst_5 = arith.constant 0.000000e+00 : f32
    %6 = vector.broadcast %cst_5 : f32 to vector<8x512xf32>
    %7 = arith.maximumf %5, %6 : vector<8x512xf32>
    %8 = arith.truncf %7 : vector<8x512xf32> to vector<8x512xbf16>
    %c0_6 = arith.constant 0 : index
    %c0_7 = arith.constant 0 : index
    %9 = vector.load %arg4[%c0_6, %c0_7] : memref<512x256xbf16, #tpu.memory_space<vmem>>, vector<512x256xbf16>
    %cst_8 = arith.constant dense<0.000000e+00> : vector<8x256xf32>
    %10 = tpu.matmul %8, %9, %cst_8 {dimension_numbers = #tpu.dot_dimension_numbers<[1], [0], [0], [1], [0, 0, 1, 1], [], []>} : vector<8x512xbf16>, vector<512x256xbf16>, vector<8x256xf32> -> vector<8x256xf32>
    %c0_9 = arith.constant 0 : index
    %c0_10 = arith.constant 0 : index
    %11 = vector.load %arg5[%c0_9, %c0_10] : memref<1x256xf32, #tpu.memory_space<vmem>>, vector<1x256xf32>
    %12 = vector.broadcast %11 : vector<1x256xf32> to vector<8x256xf32>
    %13 = arith.addf %10, %12 : vector<8x256xf32>
    %cst_11 = arith.constant 0.000000e+00 : f32
    %14 = vector.broadcast %cst_11 : f32 to vector<8x256xf32>
    %15 = arith.maximumf %13, %14 : vector<8x256xf32>
    %c0_12 = arith.constant 0 : index
    %c0_13 = arith.constant 0 : index
    %16 = vector.load %arg6[%c0_12, %c0_13] : memref<8x256xf32, #tpu.memory_space<vmem>>, vector<8x256xf32>
    tpu.vector_store %arg6[%c0_12, %c0_13], %15 {strides = array<i32>} : memref<8x256xf32, #tpu.memory_space<vmem>>, vector<8x256xf32>,
    return
  }
  func.func @transform_0(%arg0: i32) -> (i32, i32) {
    %c0_i32 = arith.constant 0 : i32
    %c0_i32_0 = arith.constant 0 : i32
    %c0_i32_1 = arith.constant 0 : i32
    return %c0_i32, %c0_i32_0 : i32, i32
  }
  func.func @transform_1(%arg0: i32) -> (i32, i32) {
    %c0_i32 = arith.constant 0 : i32
    %c0_i32_0 = arith.constant 0 : i32
    %c0_i32_1 = arith.constant 0 : i32
    return %c0_i32, %c0_i32_0 : i32, i32
  }
  func.func @transform_2(%arg0: i32) -> (i32, i32) {
    %c0_i32 = arith.constant 0 : i32
    %c0_i32_0 = arith.constant 0 : i32
    %c0_i32_1 = arith.constant 0 : i32
    return %c0_i32, %c0_i32_0 : i32, i32
  }
  func.func @transform_3(%arg0: i32) -> (i32, i32) {
    %c0_i32 = arith.constant 0 : i32
    %c0_i32_0 = arith.constant 0 : i32
    %c0_i32_1 = arith.constant 0 : i32
    return %c0_i32, %c0_i32_0 : i32, i32
  }
  func.func @transform_4(%arg0: i32) -> (i32, i32) {
    %c0_i32 = arith.constant 0 : i32
    %c0_i32_0 = arith.constant 0 : i32
    %c0_i32_1 = arith.constant 0 : i32
    return %c0_i32, %c0_i32_0 : i32, i32
  }
  func.func @transform_5(%arg0: i32) -> (i32, i32) {
    %c0_i32 = arith.constant 0 : i32
    %c0_i32_0 = arith.constant 0 : i32
    %c0_i32_1 = arith.constant 0 : i32
    return %c0_i32, %c0_i32_0 : i32, i32
  }
}

</mosaic_0001>

<bundles_post_ra>
// kernel: tpu_custom_call.1
= control target key start
LH: loop header
LB: loop body
LE: loop exit
PB: predicated region body
PF: predicated region fallthrough
CT: control target
= control target key end

     0   :  { %10 = vsyncpa [#allocation3], 0  ;;  %s3536_s0 = inlined_call_operand.hbm [shape: bf16[8,1000], index: 0, kind: input, shape index: {}]   ;;  %s3537_s1 = inlined_call_operand.hbm [shape: bf16[1000,512], index: 1, kind: input, shape index: {}]   ;;  %s3538_s2 = inlined_call_operand.hbm [shape: f32[1,512], index: 2, kind: input, shape index: {}]   ;;  %s3539_s3 = inlined_call_operand.hbm [shape: bf16[512,256], index: 3, kind: input, shape index: {}]   ;;  %s3540_s4 = inlined_call_operand.vmem [shape: f32[1,256], index: 4, kind: input, shape index: {}]   ;;  %s3541_s5 = inlined_call_operand.hbm [shape: f32[8,256], index: 5, kind: output, shape index: {}]  }
   0x1   :  { %11 = vsyncpa [#allocation6], 0 }
   0x2   :  { %12 = vsyncpa [#allocation9], 0 }
   0x3   :  { %13 = vsyncpa [#allocation4], 0  ;;  %s3403_s18 = smov [#allocation5]  }
   0x4   :  { %s29_s19 = sshll.u32 %s3403_s18, 4  ;;  %s30_s19 = int_to_ptr.vmem [resolvable:$true] %s29_s19 }
   0x5   :  { %s3303_s20 = scalar_lea.vmem %s30_s19, 32000  ;;  %p3308_p1 = scmp.lt.s32.totalorder %s30_s19, %s30_s19 }
   0x6   :  { %p3304_p0 = scmp.ne.s32.totalorder %s30_s19, %s3303_s20  ;;  %p3309_p2 = scmp.lt.s32.totalorder %s3303_s20, %s3303_s20 }
   0x8   :  { %p3310_p3 = por %p3309_p2, %p3308_p1 }
   0xa   :  { %p3311_p4 = pnand %p3310_p3, %p3304_p0 }
   0xc   :  { %3314 = shalt.err (!%p3311_p4)
}
   0xd   :  { %s3404_s21 = smov 256   ;;  %s3405_s22 = smov 16  }
   0xe   :  { %35 = dma.hbm_to_vmem [thread:$0]  %s3537_s1, 32000, %s30_s19, [#allocation6], %s3404_s21, %s3404_s21, %s3405_s22  }
   0xf   :  { %s3406_s25 = smov [#allocation2]   ;;  %s3407_s27 = smov [#allocation7]  }
  0x10   :  { %s20_s26 = sshll.u32 %s3406_s25, 4  ;;  %s42_s28 = sshll.u32 %s3407_s27, 4  ;;  %s21_s26 = int_to_ptr.vmem [resolvable:$true] %s20_s26  ;;  %s43_s28 = int_to_ptr.vmem [resolvable:$true] %s42_s28 }
  0x11   :  { %s3323_s29 = scalar_lea.vmem %s21_s26, 512  ;;  %p3328_p6 = scmp.lt.s32.totalorder %s21_s26, %s21_s26 }
  0x12   :  { %p3324_p5 = scmp.ne.s32.totalorder %s21_s26, %s3323_s29  ;;  %p3329_p7 = scmp.lt.s32.totalorder %s3323_s29, %s3323_s29 }
  0x14   :  { %p3330_p8 = por %p3329_p7, %p3328_p6 }
  0x16   :  { %p3331_p9 = pnand %p3330_p8, %p3324_p5 }
  0x18   :  { %3334 = shalt.err (!%p3331_p9)
}
  0x19   :  { %23 = dma.hbm_to_vmem [thread:$0]  %s3536_s0, 512, %s21_s26, [#allocation3]  }
  0x1a   :  { %s3343_s7 = scalar_lea.vmem %s43_s28, 64  ;;  %p3348_p11 = scmp.lt.s32.totalorder %s43_s28, %s43_s28 }
  0x1b   :  { %p3344_p10 = scmp.ne.s32.totalorder %s43_s28, %s3343_s7  ;;  %p3349_p12 = scmp.lt.s32.totalorder %s3343_s7, %s3343_s7 }
  0x1d   :  { %p3350_p13 = por %p3349_p12, %p3348_p11 }
  0x1f   :  { %p3351_p0 = pnand %p3350_p13, %p3344_p10 }
  0x21   :  { %3354 = shalt.err (!%p3351_p0)
}
  0x22   :  { %45 = dma.hbm_to_vmem [thread:$0]  %s3538_s2, 64, %s43_s28, [#allocation6]  }
  0x23   :  { %s3408_s9 = smov [#allocation8]  }
  0x24   :  { %s51_s10 = sshll.u32 %s3408_s9, 4  ;;  %s52_s10 = int_to_ptr.vmem [resolvable:$true] %s51_s10 }
  0x25   :  { %s3363_s11 = scalar_lea.vmem %s52_s10, 8192  ;;  %p3368_p2 = scmp.lt.s32.totalorder %s52_s10, %s52_s10 }
  0x26   :  { %p3364_p1 = scmp.ne.s32.totalorder %s52_s10, %s3363_s11  ;;  %p3369_p3 = scmp.lt.s32.totalorder %s3363_s11, %s3363_s11 }
  0x28   :  { %p3370_p4 = por %p3369_p3, %p3368_p2 }
  0x2a   :  { %p3371_p5 = pnand %p3370_p4, %p3364_p1 }
  0x2c   :  { %3374 = shalt.err (!%p3371_p5)
}
  0x2d   :  { %s3409_s0 = smov 128   ;;  %s3410_s12 = smov 8  }
  0x2e   :  { %57 = dma.hbm_to_vmem [thread:$0]  %s3539_s3, 8192, %s52_s10, [#allocation9], %s3409_s0, %s3409_s0, %s3410_s12  }
  0x2f   :  { %3395 = dma.done.wait [#allocation3], 512  }
  0x30   :  { %3396 = vsyncadd [#allocation3], 4294966784 }
  0x31   :  { %3397 = dma.done.wait [#allocation6], 32064  }
  0x32   :  { %3398 = vsyncadd [#allocation6], 4294935232 }
  0x33   :  { %3399 = dma.done.wait [#allocation9], 8192  }
  0x34   :  { %3400 = vsyncadd [#allocation9], 4294959104  ;;  %v2815_v0 = vld [vmem:[#allocation5 + $0xe4] ss:$16 sps:$4 sm:$0xff]   ;;  %v2819_v2 = vld [vmem:[#allocation5 + $0xe0] ss:$16 sps:$4 sm:$0xff]  }
  0x35   :  { %v2817_v1 = vld [vmem:[#allocation5 + $0x2e4] ss:$16 sps:$4 sm:$0xff]   ;;  %1643 = vmatprep.subr.bf16.mxu0 %v2815_v0  ;;  %v2820_v3 = vld [vmem:[#allocation5 + $0x2e0] ss:$16 sps:$4 sm:$0xff]   ;;  %v74_v48 = vld [vmem:[#allocation2 + $0x8] sm:$0xff]  ;;  %vm1626_vm0 = vcmask 850944  }
  0x36   :  { %1684 = vmatprep.subr.bf16.mxu1 %v2817_v1  ;;  %v2821_v4 = vld [vmem:[#allocation5 + $0xc4] ss:$16 sps:$4 sm:$0xff]   ;;  %1644 = vmatpush1.bf16.msra.mxu0 %v2819_v2  ;;  %v2825_v6 = vld [vmem:[#allocation5 + $0xc0] ss:$16 sps:$4 sm:$0xff]   ;;  %v3456_v51 = vcombine.high %v74_v48, %v74_v48  ;;  %vm1630_vm1 = vcmask 1043456   ;;  %s3411_s15 = smov [#allocation10]  }
  0x37   :  { %1685 = vmatpush1.bf16.msra.mxu1 %v2820_v3  ;;  %v2823_v5 = vld [vmem:[#allocation5 + $0x2c4] ss:$16 sps:$4 sm:$0xff]   ;;  %1645 = vmatprep.subr.bf16.mxu0 %v2821_v4  ;;  %v2826_v7 = vld [vmem:[#allocation5 + $0x2c0] ss:$16 sps:$4 sm:$0xff]   ;;  %s2467_s16 = sshll.u32 %s3411_s15, 4  ;;  %s2468_s16 = int_to_ptr.vmem [resolvable:$true] %s2467_s16 }
  0x38   :  { %1686 = vmatprep.subr.bf16.mxu1 %v2823_v5  ;;  %v2827_v8 = vld [vmem:[#allocation5 + $0xa4] ss:$16 sps:$4 sm:$0xff]   ;;  %v2831_v10 = vld [vmem:[#allocation5 + $0xa0] ss:$16 sps:$4 sm:$0xff]   ;;  %1716 = vmatprep.mubr.bf16.mxu1 %v3456_v51  ;;  %p3380_p7 = scmp.lt.s32.totalorder %s2468_s16, %s2468_s16 }
  0x39   :  { %v2829_v9 = vld [vmem:[#allocation5 + $0x2a4] ss:$16 sps:$4 sm:$0xff]   ;;  %v2832_v11 = vld [vmem:[#allocation5 + $0x2a0] ss:$16 sps:$4 sm:$0xff]  }
  0x3a   :  { %1646 = vmatpush1.bf16.msra.mxu0 %v2825_v6  ;;  %v2833_v12 = vld [vmem:[#allocation5 + $0x84] ss:$16 sps:$4 sm:$0xff]   ;;  %v2837_v14 = vld [vmem:[#allocation5 + $0x80] ss:$16 sps:$4 sm:$0xff]  }
  0x3b   :  { %1687 = vmatpush1.bf16.msra.mxu1 %v2826_v7  ;;  %1647 = vmatprep.subr.bf16.mxu0 %v2827_v8  ;;  %v2835_v13 = vld [vmem:[#allocation5 + $0x284] ss:$16 sps:$4 sm:$0xff]   ;;  %v2838_v15 = vld [vmem:[#allocation5 + $0x280] ss:$16 sps:$4 sm:$0xff]   ;;  %v3462_v7 = vcombine.low %v74_v48, %v74_v48 }
  0x3c   :  { %1688 = vmatprep.subr.bf16.mxu1 %v2829_v9  ;;  %v2839_v16 = vld [vmem:[#allocation5 + $0x64] ss:$16 sps:$4 sm:$0xff]   ;;  %v2843_v18 = vld [vmem:[#allocation5 + $0x60] ss:$16 sps:$4 sm:$0xff]  }
  0x3d   :  { %v2841_v17 = vld [vmem:[#allocation5 + $0x264] ss:$16 sps:$4 sm:$0xff]   ;;  %v2844_v19 = vld [vmem:[#allocation5 + $0x260] ss:$16 sps:$4 sm:$0xff]  }
  0x3e   :  { %1648 = vmatpush1.bf16.msra.mxu0 %v2831_v10  ;;  %v2845_v20 = vld [vmem:[#allocation5 + $0x44] ss:$16 sps:$4 sm:$0xff]   ;;  %v2849_v22 = vld [vmem:[#allocation5 + $0x40] ss:$16 sps:$4 sm:$0xff]  }
  0x3f   :  { %1689 = vmatpush1.bf16.msra.mxu1 %v2832_v11  ;;  %1649 = vmatprep.subr.bf16.mxu0 %v2833_v12  ;;  %v2847_v21 = vld [vmem:[#allocation5 + $0x244] ss:$16 sps:$4 sm:$0xff]   ;;  %v2850_v23 = vld [vmem:[#allocation5 + $0x240] ss:$16 sps:$4 sm:$0xff]  }
  0x40   :  { %1690 = vmatprep.subr.bf16.mxu1 %v2835_v13  ;;  %v2851_v24 = vld [vmem:[#allocation5 + $0x24] ss:$16 sps:$4 sm:$0xff]   ;;  %v2855_v26 = vld [vmem:[#allocation5 + $0x20] ss:$16 sps:$4 sm:$0xff]  }
  0x41   :  { %v2853_v25 = vld [vmem:[#allocation5 + $0x224] ss:$16 sps:$4 sm:$0xff]   ;;  %v2856_v27 = vld [vmem:[#allocation5 + $0x220] ss:$16 sps:$4 sm:$0xff]  }
  0x42   :  { %1650 = vmatpush1.bf16.msra.mxu0 %v2837_v14  ;;  %v2857_v28 = vld [vmem:[#allocation5 + $0x4] ss:$16 sps:$4 sm:$0xff]   ;;  %v2861_v30 = vld [vmem:[#allocation5] ss:$16 sps:$4 sm:$0xff]  }
  0x43   :  { %1691 = vmatpush1.bf16.msra.mxu1 %v2838_v15  ;;  %1651 = vmatprep.subr.bf16.mxu0 %v2839_v16  ;;  %v2859_v29 = vld [vmem:[#allocation5 + $0x204] ss:$16 sps:$4 sm:$0xff]   ;;  %v2862_v31 = vld [vmem:[#allocation5 + $0x200] ss:$16 sps:$4 sm:$0xff]  }
  0x44   :  { %1692 = vmatprep.subr.bf16.mxu1 %v2841_v17  ;;  %v2863_v32 = vld [vmem:[#allocation5 + $0x1e4] ss:$16 sps:$4 sm:$0xff]   ;;  %v2867_v34 = vld [vmem:[#allocation5 + $0x1e0] ss:$16 sps:$4 sm:$0xff]  }
  0x45   :  { %v2865_v33 = vld [vmem:[#allocation5 + $0x3e4] ss:$16 sps:$4 sm:$0xff]   ;;  %v2868_v35 = vld [vmem:[#allocation5 + $0x3e0] ss:$16 sps:$4 sm:$0xff]  }
  0x46   :  { %1652 = vmatpush1.bf16.msra.mxu0 %v2843_v18  ;;  %v2869_v36 = vld [vmem:[#allocation5 + $0x1c4] ss:$16 sps:$4 sm:$0xff]   ;;  %v2873_v38 = vld [vmem:[#allocation5 + $0x1c0] ss:$16 sps:$4 sm:$0xff]  }
  0x47   :  { %1693 = vmatpush1.bf16.msra.mxu1 %v2844_v19  ;;  %1653 = vmatprep.subr.bf16.mxu0 %v2845_v20  ;;  %v2871_v37 = vld [vmem:[#allocation5 + $0x3c4] ss:$16 sps:$4 sm:$0xff]   ;;  %v2874_v39 = vld [vmem:[#allocation5 + $0x3c0] ss:$16 sps:$4 sm:$0xff]  }
  0x48   :  { %1694 = vmatprep.subr.bf16.mxu1 %v2847_v21  ;;  %v2875_v40 = vld [vmem:[#allocation5 + $0x1a4] ss:$16 sps:$4 sm:$0xff]   ;;  %v2879_v42 = vld [vmem:[#allocation5 + $0x1a0] ss:$16 sps:$4 sm:$0xff]  }
  0x49   :  { %v2877_v41 = vld [vmem:[#allocation5 + $0x3a4] ss:$16 sps:$4 sm:$0xff]   ;;  %v2880_v43 = vld [vmem:[#allocation5 + $0x3a0] ss:$16 sps:$4 sm:$0xff]  }
  0x4a   :  { %1654 = vmatpush1.bf16.msra.mxu0 %v2849_v22  ;;  %v2881_v44 = vld [vmem:[#allocation5 + $0x184] ss:$16 sps:$4 sm:$0xff]   ;;  %v2885_v49 = vld [vmem:[#allocation5 + $0x180] ss:$16 sps:$4 sm:$0xff]  }
  0x4b   :  { %1695 = vmatpush1.bf16.msra.mxu1 %v2850_v23  ;;  %1655 = vmatprep.subr.bf16.mxu0 %v2851_v24  ;;  %v2883_v45 = vld [vmem:[#allocation5 + $0x384] ss:$16 sps:$4 sm:$0xff]   ;;  %v2886_v50 = vld [vmem:[#allocation5 + $0x380] ss:$16 sps:$4 sm:$0xff]  }
  0x4c   :  { %1696 = vmatprep.subr.bf16.mxu1 %v2853_v25  ;;  %v73_v46 = vld [vmem:[#allocation2] sm:$0xff] }
  0x4d   :  { %v3454_v47 = vcombine.high %v73_v46, %v73_v46  ;;  %v2887_v52 = vld [vmem:[#allocation5 + $0x164] ss:$16 sps:$4 sm:$0xff]   ;;  %v2891_v54 = vld [vmem:[#allocation5 + $0x160] ss:$16 sps:$4 sm:$0xff]   ;;  %v3460_v6 = vcombine.low %v73_v46, %v73_v46 }
  0x4e   :  { %1656 = vmatpush1.bf16.msra.mxu0 %v2855_v26  ;;  %v2889_v53 = vld [vmem:[#allocation5 + $0x364] ss:$16 sps:$4 sm:$0xff]   ;;  %v2892_v55 = vld [vmem:[#allocation5 + $0x360] ss:$16 sps:$4 sm:$0xff]  }
  0x4f   :  { %1697 = vmatpush1.bf16.msra.mxu1 %v2856_v27  ;;  %1657 = vmatprep.subr.bf16.mxu0 %v2857_v28  ;;  %v2893_v56 = vld [vmem:[#allocation5 + $0x144] ss:$16 sps:$4 sm:$0xff]   ;;  %v2897_v58 = vld [vmem:[#allocation5 + $0x140] ss:$16 sps:$4 sm:$0xff]   ;;  %v3466_v28 = vld [vmem:[#allocation2 + $0x18] sm:$0xff] }
  0x50   :  { %1698 = vmatprep.subr.bf16.mxu1 %v2859_v29  ;;  %1675 = vmatprep.mubr.bf16.mxu0 %v3454_v47  ;;  %v2895_v57 = vld [vmem:[#allocation5 + $0x344] ss:$16 sps:$4 sm:$0xff]   ;;  %v2898_v59 = vld [vmem:[#allocation5 + $0x340] ss:$16 sps:$4 sm:$0xff]  }
  0x51   :  { %v2899_v60 = vld [vmem:[#allocation5 + $0x124] ss:$16 sps:$4 sm:$0xff]   ;;  %v2903_v62 = vld [vmem:[#allocation5 + $0x120] ss:$16 sps:$4 sm:$0xff]  }
  0x52   :  { %1658 = vmatpush1.bf16.msra.mxu0 %v2861_v30  ;;  %v2901_v61 = vld [vmem:[#allocation5 + $0x324] ss:$16 sps:$4 sm:$0xff]   ;;  %v2904_v63 = vld [vmem:[#allocation5 + $0x320] ss:$16 sps:$4 sm:$0xff]  }
  0x53   :  { %1699 = vmatpush1.bf16.msra.mxu1 %v2862_v31  ;;  %1659 = vmatprep.subr.bf16.mxu0 %v2863_v32  ;;  %v2905_v0 = vld [vmem:[#allocation5 + $0x104] ss:$16 sps:$4 sm:$0xff]   ;;  %v2909_v2 = vld [vmem:[#allocation5 + $0x100] ss:$16 sps:$4 sm:$0xff]   ;;  %v3470_v31 = vcombine.high %v3466_v28, %v3466_v28 }
  0x54   :  { %1700 = vmatprep.subr.bf16.mxu1 %v2865_v33  ;;  %v2907_v1 = vld [vmem:[#allocation5 + $0x304] ss:$16 sps:$4 sm:$0xff]   ;;  %v2910_v3 = vld [vmem:[#allocation5 + $0x300] ss:$16 sps:$4 sm:$0xff]  }
  0x55   :  { %v2917_v4 = vld [vmem:[#allocation5 + $0x4e4] ss:$16 sps:$4 sm:$0xff]   ;;  %v2915_v8 = vld [vmem:[#allocation5 + $0x4e0] ss:$16 sps:$4 sm:$0xff]  }
  0x56   :  { %1660 = vmatpush2.bf16.msra.mxu0 %v2867_v34  ;;  %v2920_v5 = vld [vmem:[#allocation5 + $0x6e4] ss:$16 sps:$4 sm:$0xff]   ;;  %v2918_v9 = vld [vmem:[#allocation5 + $0x6e0] ss:$16 sps:$4 sm:$0xff]  }
  0x57   :  { %1701 = vmatpush2.bf16.msra.mxu1 %v2868_v35  ;;  %1661 = vmatprep.subr.bf16.mxu0 %v2869_v36  ;;  %v2923_v10 = vld [vmem:[#allocation5 + $0x4c4] ss:$16 sps:$4 sm:$0xff]   ;;  %v2921_v12 = vld [vmem:[#allocation5 + $0x4c0] ss:$16 sps:$4 sm:$0xff]  }
  0x58   :  { %1702 = vmatprep.subr.bf16.mxu1 %v2871_v37  ;;  %v2926_v11 = vld [vmem:[#allocation5 + $0x6c4] ss:$16 sps:$4 sm:$0xff]   ;;  %v2924_v13 = vld [vmem:[#allocation5 + $0x6c0] ss:$16 sps:$4 sm:$0xff]  }
  0x59   :  { %v2929_v14 = vld [vmem:[#allocation5 + $0x4a4] ss:$16 sps:$4 sm:$0xff]   ;;  %v2927_v16 = vld [vmem:[#allocation5 + $0x4a0] ss:$16 sps:$4 sm:$0xff]  }
  0x5a   :  { %1662 = vmatpush2.bf16.msra.mxu0 %v2873_v38  ;;  %v2932_v15 = vld [vmem:[#allocation5 + $0x6a4] ss:$16 sps:$4 sm:$0xff]   ;;  %v2930_v17 = vld [vmem:[#allocation5 + $0x6a0] ss:$16 sps:$4 sm:$0xff]  }
  0x5b   :  { %1703 = vmatpush2.bf16.msra.mxu1 %v2874_v39  ;;  %1663 = vmatprep.subr.bf16.mxu0 %v2875_v40  ;;  %v2935_v18 = vld [vmem:[#allocation5 + $0x484] ss:$16 sps:$4 sm:$0xff]   ;;  %v2933_v20 = vld [vmem:[#allocation5 + $0x480] ss:$16 sps:$4 sm:$0xff]  }
  0x5c   :  { %1704 = vmatprep.subr.bf16.mxu1 %v2877_v41  ;;  %v2938_v19 = vld [vmem:[#allocation5 + $0x684] ss:$16 sps:$4 sm:$0xff]   ;;  %v2936_v21 = vld [vmem:[#allocation5 + $0x680] ss:$16 sps:$4 sm:$0xff]  }
  0x5d   :  { %v2941_v22 = vld [vmem:[#allocation5 + $0x464] ss:$16 sps:$4 sm:$0xff]   ;;  %v2939_v24 = vld [vmem:[#allocation5 + $0x460] ss:$16 sps:$4 sm:$0xff]  }
  0x5e   :  { %1664 = vmatpush2.bf16.msra.mxu0 %v2879_v42  ;;  %v2944_v23 = vld [vmem:[#allocation5 + $0x664] ss:$16 sps:$4 sm:$0xff]   ;;  %v2942_v25 = vld [vmem:[#allocation5 + $0x660] ss:$16 sps:$4 sm:$0xff]  }
  0x5f   :  { %1705 = vmatpush2.bf16.msra.mxu1 %v2880_v43  ;;  %1665 = vmatprep.subr.bf16.mxu0 %v2881_v44  ;;  %v2947_v26 = vld [vmem:[#allocation5 + $0x444] ss:$16 sps:$4 sm:$0xff]   ;;  %v2945_v29 = vld [vmem:[#allocation5 + $0x440] ss:$16 sps:$4 sm:$0xff]  }
  0x60   :  { %1706 = vmatprep.subr.bf16.mxu1 %v2883_v45  ;;  %v2950_v27 = vld [vmem:[#allocation5 + $0x644] ss:$16 sps:$4 sm:$0xff]   ;;  %v2948_v30 = vld [vmem:[#allocation5 + $0x640] ss:$16 sps:$4 sm:$0xff]  }
  0x61   :  { %v2953_v32 = vld [vmem:[#allocation5 + $0x424] ss:$16 sps:$4 sm:$0xff]   ;;  %v2951_v36 = vld [vmem:[#allocation5 + $0x420] ss:$16 sps:$4 sm:$0xff]  }
  0x62   :  { %1666 = vmatpush2.bf16.msra.mxu0 %v2885_v49  ;;  %v2956_v33 = vld [vmem:[#allocation5 + $0x624] ss:$16 sps:$4 sm:$0xff]   ;;  %v2954_v37 = vld [vmem:[#allocation5 + $0x620] ss:$16 sps:$4 sm:$0xff]  }
  0x63   :  { %1707 = vmatpush2.bf16.msra.mxu1 %v2886_v50  ;;  %1667 = vmatprep.subr.bf16.mxu0 %v2887_v52  ;;  %v3472_v34 = vld [vmem:[#allocation2 + $0x10] sm:$0xff]  ;;  %v325_v40 = vld [vmem:[#allocation5 + $0x7c0] sm:$0xff] }
  0x64   :  { %1708 = vmatprep.subr.bf16.mxu1 %v2889_v53  ;;  %v3478_v35 = vcombine.high %v3472_v34, %v3472_v34  ;;  %v2959_v38 = vld [vmem:[#allocation5 + $0x404] ss:$16 sps:$4 sm:$0xff]   ;;  %v2957_v41 = vld [vmem:[#allocation5 + $0x400] ss:$16 sps:$4 sm:$0xff]   ;;  %v2735_v44 = vcombine.high %v325_v40, %v325_v40  ;;  %v2734_v45 = vcombine.low %v325_v40, %v325_v40  ;;  %v3044_v40 = vld [vmem:[#allocation5 + $0x28] ss:$16 sps:$4 sm:$0xff]  }
  0x65   :  { %v2962_v39 = vld [vmem:[#allocation5 + $0x604] ss:$16 sps:$4 sm:$0xff]   ;;  %v2960_v42 = vld [vmem:[#allocation5 + $0x600] ss:$16 sps:$4 sm:$0xff]  }
  0x66   :  { %1668 = vmatpush2.bf16.msra.mxu0 %v2891_v54  ;;  %v2965_v43 = vld [vmem:[#allocation5 + $0x5e4] ss:$16 sps:$4 sm:$0xff]   ;;  %v2963_v46 = vld [vmem:[#allocation5 + $0x5e0] ss:$16 sps:$4 sm:$0xff]   ;;  %v1632_v48 = vsel %vm1630_vm1, %v2734_v45, 0 }
  0x67   :  { %1709 = vmatpush2.bf16.msra.mxu1 %v2892_v55  ;;  %1669 = vmatprep.subr.bf16.mxu0 %v2893_v56  ;;  %v2970_v49 = vld [vmem:[#allocation5 + $0x5c4] ss:$16 sps:$4 sm:$0xff]   ;;  %v2968_v52 = vld [vmem:[#allocation5 + $0x5c0] ss:$16 sps:$4 sm:$0xff]   ;;  %v3053_v45 = vld [vmem:[#allocation5 + $0x228] ss:$16 sps:$4 sm:$0xff]  }
  0x68   :  { %1710 = vmatprep.subr.bf16.mxu1 %v2895_v57  ;;  %v2973_v50 = vld [vmem:[#allocation5 + $0x7a4] ss:$16 sps:$4 sm:$0xff]   ;;  %v2971_v53 = vld [vmem:[#allocation5 + $0x7a0] ss:$16 sps:$4 sm:$0xff]  }
  0x69   :  { %v2976_v54 = vld [vmem:[#allocation5 + $0x5a4] ss:$16 sps:$4 sm:$0xff]   ;;  %v2974_v56 = vld [vmem:[#allocation5 + $0x5a0] ss:$16 sps:$4 sm:$0xff]  }
  0x6a   :  { %1670 = vmatpush2.bf16.msra.mxu0 %v2897_v58  ;;  %v2979_v55 = vld [vmem:[#allocation5 + $0x784] ss:$16 sps:$4 sm:$0xff]   ;;  %v2977_v57 = vld [vmem:[#allocation5 + $0x780] ss:$16 sps:$4 sm:$0xff]  }
  0x6b   :  { %1711 = vmatpush2.bf16.msra.mxu1 %v2898_v59  ;;  %1671 = vmatprep.subr.bf16.mxu0 %v2899_v60  ;;  %v2982_v58 = vld [vmem:[#allocation5 + $0x584] ss:$16 sps:$4 sm:$0xff]   ;;  %v2980_v60 = vld [vmem:[#allocation5 + $0x580] ss:$16 sps:$4 sm:$0xff]  }
  0x6c   :  { %1712 = vmatprep.subr.bf16.mxu1 %v2901_v61  ;;  %v2985_v59 = vld [vmem:[#allocation5 + $0x764] ss:$16 sps:$4 sm:$0xff]   ;;  %v2983_v61 = vld [vmem:[#allocation5 + $0x760] ss:$16 sps:$4 sm:$0xff]  }
  0x6e   :  { %1672 = vmatpush2.bf16.msra.mxu0 %v2903_v62  ;;  %v2988_v62 = vld [vmem:[#allocation5 + $0x564] ss:$16 sps:$4 sm:$0xff]  }
  0x6f   :  { %1713 = vmatpush2.bf16.msra.mxu1 %v2904_v63  ;;  %1673 = vmatprep.subr.bf16.mxu0 %v2905_v0  ;;  %v2991_v63 = vld [vmem:[#allocation5 + $0x744] ss:$16 sps:$4 sm:$0xff]   ;;  %v2986_v0 = vld [vmem:[#allocation5 + $0x560] ss:$16 sps:$4 sm:$0xff]  }
  0x70   :  { %1714 = vmatprep.subr.bf16.mxu1 %v2907_v1  ;;  %v2989_v1 = vld [vmem:[#allocation5 + $0x740] ss:$16 sps:$4 sm:$0xff]  }
  0x72   :  { %1674 = vmatpush2.bf16.msra.mxu0 %v2909_v2  ;;  %v2994_v2 = vld [vmem:[#allocation5 + $0x544] ss:$16 sps:$4 sm:$0xff]  }
  0x73   :  { %1715 = vmatpush2.bf16.msra.mxu1 %v2910_v3  ;;  %1725 = vmatprep.subr.bf16.mxu0 %v2917_v4  ;;  %v2997_v3 = vld [vmem:[#allocation5 + $0x724] ss:$16 sps:$4 sm:$0xff]   ;;  %v2992_v4 = vld [vmem:[#allocation5 + $0x540] ss:$16 sps:$4 sm:$0xff]  }
  0x74   :  { %1766 = vmatprep.subr.bf16.mxu1 %v2920_v5  ;;  %v2995_v5 = vld [vmem:[#allocation5 + $0x720] ss:$16 sps:$4 sm:$0xff]  }
  0x75   :  { %1676 = vmatmul.mubr.bf16.vlgmr.msra.gmra.mxu0 %v3460_v6 }
  0x76   :  { %1717 = vmatmul.mubr.bf16.vlgmr.msra.gmra.mxu1 %v3462_v7  ;;  %1726 = vmatpush1.bf16.msra.mxu0 %v2915_v8  ;;  %v3000_v8 = vld [vmem:[#allocation5 + $0x524] ss:$16 sps:$4 sm:$0xff]  }
  0x77   :  { %1767 = vmatpush1.bf16.msra.mxu1 %v2918_v9  ;;  %1727 = vmatprep.subr.bf16.mxu0 %v2923_v10  ;;  %v3003_v9 = vld [vmem:[#allocation5 + $0x704] ss:$16 sps:$4 sm:$0xff]   ;;  %v2998_v10 = vld [vmem:[#allocation5 + $0x520] ss:$16 sps:$4 sm:$0xff]  }
  0x78   :  { %1768 = vmatprep.subr.bf16.mxu1 %v2926_v11  ;;  %2739 = vmatprep.mubr.msk.bf16.mxu1 %vm1626_vm0, %v3470_v31  ;;  %v3001_v11 = vld [vmem:[#allocation5 + $0x700] ss:$16 sps:$4 sm:$0xff]  }
  0x79   :  { %1757 = vmatprep.mubr.bf16.mxu0 %v3478_v35 }
  0x7a   :  { %1728 = vmatpush1.bf16.msra.mxu0 %v2921_v12  ;;  %v3007_v12 = vld [vmem:[#allocation5 + $0x504] ss:$16 sps:$4 sm:$0xff]  }
  0x7b   :  { %1769 = vmatpush1.bf16.msra.mxu1 %v2924_v13  ;;  %1729 = vmatprep.subr.bf16.mxu0 %v2929_v14  ;;  %v3011_v13 = vld [vmem:[#allocation5 + $0xec] ss:$16 sps:$4 sm:$0xff]   ;;  %v3005_v14 = vld [vmem:[#allocation5 + $0x500] ss:$16 sps:$4 sm:$0xff]  }
  0x7c   :  { %1770 = vmatprep.subr.bf16.mxu1 %v2932_v15  ;;  %v3485_v15 = vcombine.low %v3466_v28, %v3466_v28  ;;  %v3026_v28 = vld [vmem:[#allocation5 + $0x88] ss:$16 sps:$4 sm:$0xff]  }
  0x7e   :  { %1730 = vmatpush1.bf16.msra.mxu0 %v2927_v16  ;;  %v3009_v16 = vld [vmem:[#allocation5 + $0xe8] ss:$16 sps:$4 sm:$0xff]  }
  0x7f   :  { %1771 = vmatpush1.bf16.msra.mxu1 %v2930_v17  ;;  %1731 = vmatprep.subr.bf16.mxu0 %v2935_v18  ;;  %v3016_v17 = vld [vmem:[#allocation5 + $0xcc] ss:$16 sps:$4 sm:$0xff]  }
  0x80   :  { %1772 = vmatprep.subr.bf16.mxu1 %v2938_v19  ;;  %v3019_v18 = vld [vmem:[#allocation5 + $0x2ec] ss:$16 sps:$4 sm:$0xff]   ;;  %v3490_v19 = vcombine.low %v3472_v34, %v3472_v34 }
  0x81   :  { %v3040_v34 = vld [vmem:[#allocation5 + $0x4c] ss:$16 sps:$4 sm:$0xff]  }
  0x82   :  { %1732 = vmatpush1.bf16.msra.mxu0 %v2933_v20  ;;  %v3014_v20 = vld [vmem:[#allocation5 + $0xc8] ss:$16 sps:$4 sm:$0xff]  }
  0x83   :  { %1773 = vmatpush1.bf16.msra.mxu1 %v2936_v21  ;;  %1733 = vmatprep.subr.bf16.mxu0 %v2941_v22  ;;  %v3017_v21 = vld [vmem:[#allocation5 + $0x2e8] ss:$16 sps:$4 sm:$0xff]   ;;  %v3022_v22 = vld [vmem:[#allocation5 + $0xac] ss:$16 sps:$4 sm:$0xff]  }
  0x84   :  { %1774 = vmatprep.subr.bf16.mxu1 %v2944_v23  ;;  %v3025_v23 = vld [vmem:[#allocation5 + $0x2cc] ss:$16 sps:$4 sm:$0xff]  }
  0x86   :  { %1734 = vmatpush1.bf16.msra.mxu0 %v2939_v24  ;;  %v3020_v24 = vld [vmem:[#allocation5 + $0xa8] ss:$16 sps:$4 sm:$0xff]  }
  0x87   :  { %1775 = vmatpush1.bf16.msra.mxu1 %v2942_v25  ;;  %1735 = vmatprep.subr.bf16.mxu0 %v2947_v26  ;;  %v3023_v25 = vld [vmem:[#allocation5 + $0x2c8] ss:$16 sps:$4 sm:$0xff]   ;;  %v3028_v26 = vld [vmem:[#allocation5 + $0x8c] ss:$16 sps:$4 sm:$0xff]  }
  0x88   :  { %1776 = vmatprep.subr.bf16.mxu1 %v2950_v27  ;;  %v3031_v27 = vld [vmem:[#allocation5 + $0x2ac] ss:$16 sps:$4 sm:$0xff]  }
  0x8a   :  { %1736 = vmatpush1.bf16.msra.mxu0 %v2945_v29  ;;  %v3029_v29 = vld [vmem:[#allocation5 + $0x2a8] ss:$16 sps:$4 sm:$0xff]  }
  0x8b   :  { %1777 = vmatpush1.bf16.msra.mxu1 %v2948_v30  ;;  %1737 = vmatprep.subr.bf16.mxu0 %v2953_v32  ;;  %v3034_v30 = vld [vmem:[#allocation5 + $0x6c] ss:$16 sps:$4 sm:$0xff]   ;;  %v3032_v32 = vld [vmem:[#allocation5 + $0x68] ss:$16 sps:$4 sm:$0xff]  }
  0x8c   :  { %1778 = vmatprep.subr.bf16.mxu1 %v2956_v33  ;;  %v3035_v33 = vld [vmem:[#allocation5 + $0x288] ss:$16 sps:$4 sm:$0xff]  }
  0x8e   :  { %1738 = vmatpush1.bf16.msra.mxu0 %v2951_v36  ;;  %v3043_v36 = vld [vmem:[#allocation5 + $0x26c] ss:$16 sps:$4 sm:$0xff]  }
  0x8f   :  { %1779 = vmatpush1.bf16.msra.mxu1 %v2954_v37  ;;  %1739 = vmatprep.subr.bf16.mxu0 %v2959_v38  ;;  %v3038_v37 = vld [vmem:[#allocation5 + $0x48] ss:$16 sps:$4 sm:$0xff]   ;;  %v3046_v38 = vld [vmem:[#allocation5 + $0x2c] ss:$16 sps:$4 sm:$0xff]  }
  0x90   :  { %1780 = vmatprep.subr.bf16.mxu1 %v2962_v39  ;;  %v3049_v39 = vld [vmem:[#allocation5 + $0x24c] ss:$16 sps:$4 sm:$0xff]  }
  0x92   :  { %1740 = vmatpush1.bf16.msra.mxu0 %v2957_v41  ;;  %v3047_v41 = vld [vmem:[#allocation5 + $0x248] ss:$16 sps:$4 sm:$0xff]  }
  0x93   :  { %1781 = vmatpush1.bf16.msra.mxu1 %v2960_v42  ;;  %1741 = vmatprep.subr.bf16.mxu0 %v2965_v43  ;;  %v3052_v42 = vld [vmem:[#allocation5 + $0xc] ss:$16 sps:$4 sm:$0xff]  }
  0x94   :  { %2738 = vmatprep.subr.msk.bf16.mxu1 %vm1630_vm1, %v2735_v44  ;;  %v3055_v43 = vld [vmem:[#allocation5 + $0x22c] ss:$16 sps:$4 sm:$0xff]   ;;  %v3050_v44 = vld [vmem:[#allocation5 + $0x8] ss:$16 sps:$4 sm:$0xff]  }
  0x96   :  { %1742 = vmatpush2.bf16.msra.mxu0 %v2963_v46  ;;  %v3058_v46 = vld [vmem:[#allocation5 + $0x1ec] ss:$16 sps:$4 sm:$0xff]  }
  0x97   :  { %1785 = vmatpush2.bf16.msra.mxu1 %v1632_v48  ;;  %1743 = vmatprep.subr.bf16.mxu0 %v2970_v49  ;;  %v3061_v48 = vld [vmem:[#allocation5 + $0x20c] ss:$16 sps:$4 sm:$0xff]   ;;  %v3056_v49 = vld [vmem:[#allocation5 + $0x1e8] ss:$16 sps:$4 sm:$0xff]  }
  0x98   :  { %1786 = vmatprep.subr.bf16.mxu1 %v2973_v50  ;;  %v3059_v50 = vld [vmem:[#allocation5 + $0x208] ss:$16 sps:$4 sm:$0xff]  }
  0x9a   :  { %1744 = vmatpush2.bf16.msra.mxu0 %v2968_v52  ;;  %v3064_v52 = vld [vmem:[#allocation5 + $0x1cc] ss:$16 sps:$4 sm:$0xff]  }
  0x9b   :  { %1787 = vmatpush2.bf16.msra.mxu1 %v2971_v53  ;;  %1745 = vmatprep.subr.bf16.mxu0 %v2976_v54  ;;  %v3067_v53 = vld [vmem:[#allocation5 + $0x3ec] ss:$16 sps:$4 sm:$0xff]   ;;  %v3062_v54 = vld [vmem:[#allocation5 + $0x1c8] ss:$16 sps:$4 sm:$0xff]  }
  0x9c   :  { %1788 = vmatprep.subr.bf16.mxu1 %v2979_v55  ;;  %v3065_v55 = vld [vmem:[#allocation5 + $0x3e8] ss:$16 sps:$4 sm:$0xff]  }
  0x9e   :  { %1746 = vmatpush2.bf16.msra.mxu0 %v2974_v56  ;;  %v3070_v56 = vld [vmem:[#allocation5 + $0x1ac] ss:$16 sps:$4 sm:$0xff]  }
  0x9f   :  { %1789 = vmatpush2.bf16.msra.mxu1 %v2977_v57  ;;  %1747 = vmatprep.subr.bf16.mxu0 %v2982_v58  ;;  %v3073_v57 = vld [vmem:[#allocation5 + $0x3cc] ss:$16 sps:$4 sm:$0xff]   ;;  %v3068_v58 = vld [vmem:[#allocation5 + $0x1a8] ss:$16 sps:$4 sm:$0xff]  }
  0xa0   :  { %1790 = vmatprep.subr.bf16.mxu1 %v2985_v59  ;;  %v3071_v59 = vld [vmem:[#allocation5 + $0x3c8] ss:$16 sps:$4 sm:$0xff]  }
  0xa2   :  { %1748 = vmatpush2.bf16.msra.mxu0 %v2980_v60  ;;  %v3076_v60 = vld [vmem:[#allocation5 + $0x18c] ss:$16 sps:$4 sm:$0xff]  }
  0xa3   :  { %1791 = vmatpush2.bf16.msra.mxu1 %v2983_v61  ;;  %1749 = vmatprep.subr.bf16.mxu0 %v2988_v62  ;;  %v3079_v61 = vld [vmem:[#allocation5 + $0x3ac] ss:$16 sps:$4 sm:$0xff]   ;;  %v3074_v62 = vld [vmem:[#allocation5 + $0x188] ss:$16 sps:$4 sm:$0xff]  }
  0xa4   :  { %1792 = vmatprep.subr.bf16.mxu1 %v2991_v63  ;;  %v3077_v63 = vld [vmem:[#allocation5 + $0x3a8] ss:$16 sps:$4 sm:$0xff]  }
  0xa6   :  { %1750 = vmatpush2.bf16.msra.mxu0 %v2986_v0  ;;  %v3082_v0 = vld [vmem:[#allocation5 + $0x16c] ss:$16 sps:$4 sm:$0xff]  }
  0xa7   :  { %1793 = vmatpush2.bf16.msra.mxu1 %v2989_v1  ;;  %1751 = vmatprep.subr.bf16.mxu0 %v2994_v2  ;;  %v3085_v1 = vld [vmem:[#allocation5 + $0x38c] ss:$16 sps:$4 sm:$0xff]   ;;  %v3080_v2 = vld [vmem:[#allocation5 + $0x168] ss:$16 sps:$4 sm:$0xff]  }
  0xa8   :  { %1794 = vmatprep.subr.bf16.mxu1 %v2997_v3  ;;  %v3083_v3 = vld [vmem:[#allocation5 + $0x388] ss:$16 sps:$4 sm:$0xff]  }
  0xaa   :  { %1752 = vmatpush2.bf16.msra.mxu0 %v2992_v4  ;;  %v3088_v4 = vld [vmem:[#allocation5 + $0x14c] ss:$16 sps:$4 sm:$0xff]  }
  0xab   :  { %1795 = vmatpush2.bf16.msra.mxu1 %v2995_v5  ;;  %1753 = vmatprep.subr.bf16.mxu0 %v3000_v8  ;;  %v3091_v5 = vld [vmem:[#allocation5 + $0x36c] ss:$16 sps:$4 sm:$0xff]   ;;  %v3086_v8 = vld [vmem:[#allocation5 + $0x148] ss:$16 sps:$4 sm:$0xff]  }
  0xac   :  { %1796 = vmatprep.subr.bf16.mxu1 %v3003_v9  ;;  %v3089_v9 = vld [vmem:[#allocation5 + $0x368] ss:$16 sps:$4 sm:$0xff]  }
  0xae   :  { %1754 = vmatpush2.bf16.msra.mxu0 %v2998_v10  ;;  %v3094_v10 = vld [vmem:[#allocation5 + $0x12c] ss:$16 sps:$4 sm:$0xff]  }
  0xaf   :  { %1797 = vmatpush2.bf16.msra.mxu1 %v3001_v11  ;;  %1755 = vmatprep.subr.bf16.mxu0 %v3007_v12  ;;  %v3097_v11 = vld [vmem:[#allocation5 + $0x34c] ss:$16 sps:$4 sm:$0xff]   ;;  %v3092_v12 = vld [vmem:[#allocation5 + $0x128] ss:$16 sps:$4 sm:$0xff]  }
  0xb0   :  { %1807 = vmatprep.subr.bf16.mxu1 %v3011_v13  ;;  %v3095_v13 = vld [vmem:[#allocation5 + $0x348] ss:$16 sps:$4 sm:$0xff]  }
  0xb2   :  { %1799 = vmatmul.mubr.bf16.vlgmr.msra.gmra.mxu1 %v3485_v15  ;;  %1756 = vmatpush2.bf16.msra.mxu0 %v3005_v14  ;;  %v3100_v14 = vld [vmem:[#allocation5 + $0x10c] ss:$16 sps:$4 sm:$0xff]  }
  0xb3   :  { %1808 = vmatpush1.bf16.msra.mxu1 %v3009_v16  ;;  %1848 = vmatprep.subr.bf16.mxu0 %v3019_v18  ;;  %v3103_v16 = vld [vmem:[#allocation5 + $0x32c] ss:$16 sps:$4 sm:$0xff]   ;;  %v3101_v18 = vld [vmem:[#allocation5 + $0x328] ss:$16 sps:$4 sm:$0xff]  }
  0xb4   :  { %1809 = vmatprep.subr.bf16.mxu1 %v3016_v17  ;;  %1839 = vmatprep.mubr.bf16.mxu1 %v3454_v47  ;;  %v3037_v47 = vld [vmem:[#allocation5 + $0x28c] ss:$16 sps:$4 sm:$0xff]   ;;  %v3098_v17 = vld [vmem:[#allocation5 + $0x108] ss:$16 sps:$4 sm:$0xff]  }
  0xb5   :  { %1758 = vmatmul.mubr.bf16.vlgmr.msra.gmra.mxu0 %v3490_v19 }
  0xb6   :  { %1849 = vmatpush1.bf16.msra.mxu0 %v3017_v21  ;;  %1880 = vmatprep.mubr.bf16.mxu0 %v3456_v51  ;;  %v3041_v51 = vld [vmem:[#allocation5 + $0x268] ss:$16 sps:$4 sm:$0xff]   ;;  %v3109_v21 = vld [vmem:[#allocation5 + $0x4ec] ss:$16 sps:$4 sm:$0xff]  }
  0xb7   :  { %1810 = vmatpush1.bf16.msra.mxu1 %v3014_v20  ;;  %1850 = vmatprep.subr.bf16.mxu0 %v3025_v23  ;;  %v3106_v20 = vld [vmem:[#allocation5 + $0x30c] ss:$16 sps:$4 sm:$0xff]   ;;  %v3107_v23 = vld [vmem:[#allocation5 + $0x4e8] ss:$16 sps:$4 sm:$0xff]  }
  0xb8   :  { %1811 = vmatprep.subr.bf16.mxu1 %v3022_v22  ;;  %v3104_v22 = vld [vmem:[#allocation5 + $0x308] ss:$16 sps:$4 sm:$0xff]  }
  0xba   :  { %1851 = vmatpush1.bf16.msra.mxu0 %v3023_v25  ;;  %v3115_v25 = vld [vmem:[#allocation5 + $0x6ec] ss:$16 sps:$4 sm:$0xff]  }
  0xbb   :  { %1812 = vmatpush1.bf16.msra.mxu1 %v3020_v24  ;;  %1852 = vmatprep.subr.bf16.mxu0 %v3031_v27  ;;  %v3112_v24 = vld [vmem:[#allocation5 + $0x4cc] ss:$16 sps:$4 sm:$0xff]   ;;  %v3113_v27 = vld [vmem:[#allocation5 + $0x6e8] ss:$16 sps:$4 sm:$0xff]  }
  0xbc   :  { %1813 = vmatprep.subr.bf16.mxu1 %v3028_v26  ;;  %v3110_v26 = vld [vmem:[#allocation5 + $0x4c8] ss:$16 sps:$4 sm:$0xff]  }
  0xbe   :  { %1853 = vmatpush1.bf16.msra.mxu0 %v3029_v29  ;;  %v3121_v29 = vld [vmem:[#allocation5 + $0x6cc] ss:$16 sps:$4 sm:$0xff]  }
  0xbf   :  { %1814 = vmatpush1.bf16.msra.mxu1 %v3026_v28  ;;  %1854 = vmatprep.subr.bf16.mxu0 %v3037_v47  ;;  %v3118_v28 = vld [vmem:[#allocation5 + $0x4ac] ss:$16 sps:$4 sm:$0xff]   ;;  %v3119_v47 = vld [vmem:[#allocation5 + $0x6c8] ss:$16 sps:$4 sm:$0xff]  }
  0xc0   :  { %1815 = vmatprep.subr.bf16.mxu1 %v3034_v30  ;;  %v3116_v30 = vld [vmem:[#allocation5 + $0x4a8] ss:$16 sps:$4 sm:$0xff]  }
  0xc2   :  { %1855 = vmatpush1.bf16.msra.mxu0 %v3035_v33  ;;  %v3127_v33 = vld [vmem:[#allocation5 + $0x6ac] ss:$16 sps:$4 sm:$0xff]  }
  0xc3   :  { %1816 = vmatpush1.bf16.msra.mxu1 %v3032_v32  ;;  %1856 = vmatprep.subr.bf16.mxu0 %v3043_v36  ;;  %v3124_v32 = vld [vmem:[#allocation5 + $0x48c] ss:$16 sps:$4 sm:$0xff]  }
  0xc4   :  { %1817 = vmatprep.subr.bf16.mxu1 %v3040_v34  ;;  %v3125_v34 = vld [vmem:[#allocation5 + $0x6a8] ss:$16 sps:$4 sm:$0xff]   ;;  %v3130_v36 = vld [vmem:[#allocation5 + $0x46c] ss:$16 sps:$4 sm:$0xff]  }
  0xc6   :  { %1857 = vmatpush1.bf16.msra.mxu0 %v3041_v51  ;;  %v3136_v51 = vld [vmem:[#allocation5 + $0x44c] ss:$16 sps:$4 sm:$0xff]  }
  0xc7   :  { %1818 = vmatpush1.bf16.msra.mxu1 %v3038_v37  ;;  %1858 = vmatprep.subr.bf16.mxu0 %v3049_v39  ;;  %v3133_v37 = vld [vmem:[#allocation5 + $0x68c] ss:$16 sps:$4 sm:$0xff]   ;;  %v3134_v39 = vld [vmem:[#allocation5 + $0x448] ss:$16 sps:$4 sm:$0xff]  }
  0xc8   :  { %1819 = vmatprep.subr.bf16.mxu1 %v3046_v38  ;;  %v3139_v38 = vld [vmem:[#allocation5 + $0x66c] ss:$16 sps:$4 sm:$0xff]  }
  0xca   :  { %1859 = vmatpush1.bf16.msra.mxu0 %v3047_v41  ;;  %v3145_v41 = vld [vmem:[#allocation5 + $0x64c] ss:$16 sps:$4 sm:$0xff]  }
  0xcb   :  { %1820 = vmatpush1.bf16.msra.mxu1 %v3044_v40  ;;  %1860 = vmatprep.subr.bf16.mxu0 %v3055_v43  ;;  %v3142_v40 = vld [vmem:[#allocation5 + $0x42c] ss:$16 sps:$4 sm:$0xff]   ;;  %v3143_v43 = vld [vmem:[#allocation5 + $0x648] ss:$16 sps:$4 sm:$0xff]  }
  0xcc   :  { %1821 = vmatprep.subr.bf16.mxu1 %v3052_v42  ;;  %v3140_v42 = vld [vmem:[#allocation5 + $0x428] ss:$16 sps:$4 sm:$0xff]  }
  0xce   :  { %1861 = vmatpush1.bf16.msra.mxu0 %v3053_v45  ;;  %v3151_v45 = vld [vmem:[#allocation5 + $0x62c] ss:$16 sps:$4 sm:$0xff]  }
  0xcf   :  { %1822 = vmatpush1.bf16.msra.mxu1 %v3050_v44  ;;  %1862 = vmatprep.subr.bf16.mxu0 %v3061_v48  ;;  %v3148_v44 = vld [vmem:[#allocation5 + $0x40c] ss:$16 sps:$4 sm:$0xff]   ;;  %v3149_v48 = vld [vmem:[#allocation5 + $0x628] ss:$16 sps:$4 sm:$0xff]  }
  0xd0   :  { %1823 = vmatprep.subr.bf16.mxu1 %v3058_v46  ;;  %v3146_v46 = vld [vmem:[#allocation5 + $0x408] ss:$16 sps:$4 sm:$0xff]  }
  0xd2   :  { %1863 = vmatpush1.bf16.msra.mxu0 %v3059_v50  ;;  %v3157_v50 = vld [vmem:[#allocation5 + $0x60c] ss:$16 sps:$4 sm:$0xff]  }
  0xd3   :  { %1824 = vmatpush2.bf16.msra.mxu1 %v3056_v49  ;;  %1864 = vmatprep.subr.bf16.mxu0 %v3067_v53  ;;  %v3154_v49 = vld [vmem:[#allocation5 + $0x5ec] ss:$16 sps:$4 sm:$0xff]   ;;  %v3152_v53 = vld [vmem:[#allocation5 + $0x5e8] ss:$16 sps:$4 sm:$0xff]  }
  0xd4   :  { %1825 = vmatprep.subr.bf16.mxu1 %v3064_v52  ;;  %v326_v52 = vld [vmem:[#allocation5 + $0x7c8] sm:$0xff] }
  0xd6   :  { %1865 = vmatpush2.bf16.msra.mxu0 %v3065_v55  ;;  %v3160_v55 = vld [vmem:[#allocation5 + $0x5cc] ss:$16 sps:$4 sm:$0xff]  }
  0xd7   :  { %1826 = vmatpush2.bf16.msra.mxu1 %v3062_v54  ;;  %1866 = vmatprep.subr.bf16.mxu0 %v3073_v57  ;;  %v3155_v54 = vld [vmem:[#allocation5 + $0x608] ss:$16 sps:$4 sm:$0xff]   ;;  %v2736_v57 = vcombine.low %v326_v52, %v326_v52 }
  0xd8   :  { %1827 = vmatprep.subr.bf16.mxu1 %v3070_v56  ;;  %v2737_v56 = vcombine.high %v326_v52, %v326_v52  ;;  %v3220_v52 = vld [vmem:[#allocation8] ss:$8 sps:$4 sm:$0xff]  }
  0xda   :  { %1867 = vmatpush2.bf16.msra.mxu0 %v3071_v59  ;;  %v1638_v59 = vsel %vm1630_vm1, %v2736_v57, 0  ;;  %v3262_v57 = vld [vmem:[#allocation8 + $0x120] ss:$8 sps:$4 sm:$0xff]  }
  0xdb   :  { %1828 = vmatpush2.bf16.msra.mxu1 %v3068_v58  ;;  %1868 = vmatprep.subr.bf16.mxu0 %v3079_v61  ;;  %v3158_v58 = vld [vmem:[#allocation5 + $0x5c8] ss:$16 sps:$4 sm:$0xff]   ;;  %v3168_v61 = vld [vmem:[#allocation5 + $0x7ac] ss:$16 sps:$4 sm:$0xff]  }
  0xdc   :  { %1829 = vmatprep.subr.bf16.mxu1 %v3076_v60  ;;  %v3165_v60 = vld [vmem:[#allocation5 + $0x5ac] ss:$16 sps:$4 sm:$0xff]  }
  0xde   :  { %1869 = vmatpush2.bf16.msra.mxu0 %v3077_v63  ;;  %v3166_v63 = vld [vmem:[#allocation5 + $0x7a8] ss:$16 sps:$4 sm:$0xff]  }
  0xdf   :  { %1830 = vmatpush2.bf16.msra.mxu1 %v3074_v62  ;;  %1870 = vmatprep.subr.bf16.mxu0 %v3085_v1  ;;  %v3163_v62 = vld [vmem:[#allocation5 + $0x5a8] ss:$16 sps:$4 sm:$0xff]   ;;  %v3174_v1 = vld [vmem:[#allocation5 + $0x78c] ss:$16 sps:$4 sm:$0xff]  }
  0xe0   :  { %1831 = vmatprep.subr.bf16.mxu1 %v3082_v0  ;;  %v3171_v0 = vld [vmem:[#allocation5 + $0x58c] ss:$16 sps:$4 sm:$0xff]  }
  0xe2   :  { %1871 = vmatpush2.bf16.msra.mxu0 %v3083_v3  ;;  %v3172_v3 = vld [vmem:[#allocation5 + $0x788] ss:$16 sps:$4 sm:$0xff]  }
  0xe3   :  { %1832 = vmatpush2.bf16.msra.mxu1 %v3080_v2  ;;  %1872 = vmatprep.subr.bf16.mxu0 %v3091_v5  ;;  %v3169_v2 = vld [vmem:[#allocation5 + $0x588] ss:$16 sps:$4 sm:$0xff]   ;;  %v3180_v5 = vld [vmem:[#allocation5 + $0x76c] ss:$16 sps:$4 sm:$0xff]  }
  0xe4   :  { %1833 = vmatprep.subr.bf16.mxu1 %v3088_v4  ;;  %v3177_v4 = vld [vmem:[#allocation5 + $0x56c] ss:$16 sps:$4 sm:$0xff]  }
  0xe6   :  { %1873 = vmatpush2.bf16.msra.mxu0 %v3089_v9  ;;  %v3178_v9 = vld [vmem:[#allocation5 + $0x768] ss:$16 sps:$4 sm:$0xff]  }
  0xe7   :  { %1834 = vmatpush2.bf16.msra.mxu1 %v3086_v8  ;;  %1874 = vmatprep.subr.bf16.mxu0 %v3097_v11  ;;  %v3175_v8 = vld [vmem:[#allocation5 + $0x568] ss:$16 sps:$4 sm:$0xff]   ;;  %v3186_v11 = vld [vmem:[#allocation5 + $0x74c] ss:$16 sps:$4 sm:$0xff]  }
  0xe8   :  { %1835 = vmatprep.subr.bf16.mxu1 %v3094_v10  ;;  %v3183_v10 = vld [vmem:[#allocation5 + $0x54c] ss:$16 sps:$4 sm:$0xff]  }
  0xea   :  { %1875 = vmatpush2.bf16.msra.mxu0 %v3095_v13  ;;  %v3184_v13 = vld [vmem:[#allocation5 + $0x748] ss:$16 sps:$4 sm:$0xff]  }
  0xeb   :  { %1836 = vmatpush2.bf16.msra.mxu1 %v3092_v12  ;;  %1876 = vmatprep.subr.bf16.mxu0 %v3103_v16  ;;  %v3181_v12 = vld [vmem:[#allocation5 + $0x548] ss:$16 sps:$4 sm:$0xff]   ;;  %v3192_v16 = vld [vmem:[#allocation5 + $0x72c] ss:$16 sps:$4 sm:$0xff]  }
  0xec   :  { %1837 = vmatprep.subr.bf16.mxu1 %v3100_v14  ;;  %v3189_v14 = vld [vmem:[#allocation5 + $0x52c] ss:$16 sps:$4 sm:$0xff]  }
  0xee   :  { %1877 = vmatpush2.bf16.msra.mxu0 %v3101_v18  ;;  %v3190_v18 = vld [vmem:[#allocation5 + $0x728] ss:$16 sps:$4 sm:$0xff]  }
  0xef   :  { %1838 = vmatpush2.bf16.msra.mxu1 %v3098_v17  ;;  %1878 = vmatprep.subr.bf16.mxu0 %v3106_v20  ;;  %v3187_v17 = vld [vmem:[#allocation5 + $0x528] ss:$16 sps:$4 sm:$0xff]   ;;  %v3195_v20 = vld [vmem:[#allocation5 + $0x50c] ss:$16 sps:$4 sm:$0xff]  }
  0xf0   :  { %1889 = vmatprep.subr.bf16.mxu1 %v3109_v21  ;;  %v3198_v21 = vld [vmem:[#allocation5 + $0x70c] ss:$16 sps:$4 sm:$0xff]  }
  0xf2   :  { %1840 = vmatmul.mubr.bf16.vlgmr.msra.gmra.mxu1 %v3460_v6  ;;  %1879 = vmatpush2.bf16.msra.mxu0 %v3104_v22  ;;  %v3122_v6 = vld [vmem:[#allocation5 + $0x488] ss:$16 sps:$4 sm:$0xff]  }
  0xf3   :  { %1890 = vmatpush1.bf16.msra.mxu1 %v3107_v23  ;;  %1930 = vmatprep.subr.bf16.mxu0 %v3115_v25  ;;  %v3193_v22 = vld [vmem:[#allocation5 + $0x508] ss:$16 sps:$4 sm:$0xff]   ;;  %v3199_v25 = vld [vmem:[#allocation8 + $0x70] ss:$8 sps:$4 sm:$0xff]  }
  0xf4   :  { %1891 = vmatprep.subr.bf16.mxu1 %v3112_v24  ;;  %1921 = vmatprep.mubr.bf16.mxu1 %v3478_v35  ;;  %v3131_v35 = vld [vmem:[#allocation5 + $0x688] ss:$16 sps:$4 sm:$0xff]  }
  0xf5   :  { %1881 = vmatmul.mubr.bf16.vlgmr.msra.gmra.mxu0 %v3462_v7  ;;  %v3128_v7 = vld [vmem:[#allocation5 + $0x468] ss:$16 sps:$4 sm:$0xff]  }
  0xf6   :  { %1931 = vmatpush1.bf16.msra.mxu0 %v3113_v27  ;;  %2741 = vmatprep.mubr.msk.bf16.mxu0 %vm1626_vm0, %v3470_v31  ;;  %v3137_v31 = vld [vmem:[#allocation5 + $0x668] ss:$16 sps:$4 sm:$0xff]   ;;  %v3202_v27 = vld [vmem:[#allocation8 + $0x60] ss:$8 sps:$4 sm:$0xff]  }
  0xf7   :  { %1892 = vmatpush1.bf16.msra.mxu1 %v3110_v26  ;;  %1932 = vmatprep.subr.bf16.mxu0 %v3121_v29  ;;  %v3196_v23 = vld [vmem:[#allocation5 + $0x708] ss:$16 sps:$4 sm:$0xff]  }
  0xf8   :  { %1893 = vmatprep.subr.bf16.mxu1 %v3118_v28  ;;  %v3201_v24 = vld [vmem:[#allocation8 + $0x74] ss:$8 sps:$4 sm:$0xff]   ;;  %v3204_v26 = vld [vmem:[#allocation8 + $0x64] ss:$8 sps:$4 sm:$0xff]  }
  0xf9   :  { %v3207_v28 = vld [vmem:[#allocation8 + $0x54] ss:$8 sps:$4 sm:$0xff]  }
  0xfa   :  { %1933 = vmatpush1.bf16.msra.mxu0 %v3119_v47  ;;  %v3205_v47 = vld [vmem:[#allocation8 + $0x50] ss:$8 sps:$4 sm:$0xff]  }
  0xfb   :  { %1894 = vmatpush1.bf16.msra.mxu1 %v3116_v30  ;;  %1934 = vmatprep.subr.bf16.mxu0 %v3127_v33 }
  0xfc   :  { %1895 = vmatprep.subr.bf16.mxu1 %v3124_v32 }
  0xfe   :  { %1935 = vmatpush1.bf16.msra.mxu0 %v3125_v34 }
  0xff   :  { %1896 = vmatpush1.bf16.msra.mxu1 %v3122_v6  ;;  %1936 = vmatprep.subr.bf16.mxu0 %v3133_v37  ;;  %v3210_v6 = vld [vmem:[#allocation8 + $0x44] ss:$8 sps:$4 sm:$0xff]  }
 0x100   :  { %1897 = vmatprep.subr.bf16.mxu1 %v3130_v36 }
 0x102   :  { %1937 = vmatpush1.bf16.msra.mxu0 %v3131_v35  ;;  %v3247_v35 = vld [vmem:[#allocation8 + $0x170] ss:$8 sps:$4 sm:$0xff]  }
 0x103   :  { %1898 = vmatpush1.bf16.msra.mxu1 %v3128_v7  ;;  %1938 = vmatprep.subr.bf16.mxu0 %v3139_v38  ;;  %v3213_v7 = vld [vmem:[#allocation8 + $0x34] ss:$8 sps:$4 sm:$0xff]   ;;  %v3252_v38 = vld [vmem:[#allocation8 + $0x164] ss:$8 sps:$4 sm:$0xff]  }
 0x104   :  { %1899 = vmatprep.subr.bf16.mxu1 %v3136_v51  ;;  %v3249_v51 = vld [vmem:[#allocation8 + $0x174] ss:$8 sps:$4 sm:$0xff]  }
 0x106   :  { %1939 = vmatpush1.bf16.msra.mxu0 %v3137_v31  ;;  %v3250_v31 = vld [vmem:[#allocation8 + $0x160] ss:$8 sps:$4 sm:$0xff]  }
 0x107   :  { %1900 = vmatpush1.bf16.msra.mxu1 %v3134_v39  ;;  %1940 = vmatprep.subr.bf16.mxu0 %v3145_v41  ;;  %v3211_v39 = vld [vmem:[#allocation8 + $0x30] ss:$8 sps:$4 sm:$0xff]   ;;  %v3255_v41 = vld [vmem:[#allocation8 + $0x154] ss:$8 sps:$4 sm:$0xff]  }
 0x108   :  { %1901 = vmatprep.subr.bf16.mxu1 %v3142_v40  ;;  %v3216_v40 = vld [vmem:[#allocation8 + $0x24] ss:$8 sps:$4 sm:$0xff]  }
 0x10a   :  { %1941 = vmatpush1.bf16.msra.mxu0 %v3143_v43  ;;  %v3253_v43 = vld [vmem:[#allocation8 + $0x150] ss:$8 sps:$4 sm:$0xff]  }
 0x10b   :  { %1902 = vmatpush1.bf16.msra.mxu1 %v3140_v42  ;;  %1942 = vmatprep.subr.bf16.mxu0 %v3151_v45  ;;  %v3214_v42 = vld [vmem:[#allocation8 + $0x20] ss:$8 sps:$4 sm:$0xff]   ;;  %v3258_v45 = vld [vmem:[#allocation8 + $0x144] ss:$8 sps:$4 sm:$0xff]  }
 0x10c   :  { %1903 = vmatprep.subr.bf16.mxu1 %v3148_v44  ;;  %v3219_v44 = vld [vmem:[#allocation8 + $0x14] ss:$8 sps:$4 sm:$0xff]  }
 0x10e   :  { %1943 = vmatpush1.bf16.msra.mxu0 %v3149_v48  ;;  %v3256_v48 = vld [vmem:[#allocation8 + $0x140] ss:$8 sps:$4 sm:$0xff]  }
 0x10f   :  { %1904 = vmatpush1.bf16.msra.mxu1 %v3146_v46  ;;  %1944 = vmatprep.subr.bf16.mxu0 %v3157_v50  ;;  %v3217_v46 = vld [vmem:[#allocation8 + $0x10] ss:$8 sps:$4 sm:$0xff]   ;;  %v3261_v50 = vld [vmem:[#allocation8 + $0x134] ss:$8 sps:$4 sm:$0xff]  }
 0x110   :  { %1905 = vmatprep.subr.bf16.mxu1 %v3154_v49  ;;  %v3222_v49 = vld [vmem:[#allocation8 + $0x4] ss:$8 sps:$4 sm:$0xff]  }
 0x112   :  { %1945 = vmatpush1.bf16.msra.mxu0 %v3155_v54  ;;  %v3225_v54 = vld [vmem:[#allocation8 + $0xf4] ss:$8 sps:$4 sm:$0xff]  }
 0x113   :  { %1906 = vmatpush2.bf16.msra.mxu1 %v3152_v53  ;;  %2740 = vmatprep.subr.msk.bf16.mxu0 %vm1630_vm1, %v2737_v56  ;;  %v3259_v53 = vld [vmem:[#allocation8 + $0x130] ss:$8 sps:$4 sm:$0xff]  }
 0x114   :  { %1907 = vmatprep.subr.bf16.mxu1 %v3160_v55  ;;  %v3264_v55 = vld [vmem:[#allocation8 + $0x124] ss:$8 sps:$4 sm:$0xff]   ;;  %v3223_v56 = vld [vmem:[#allocation8 + $0xf0] ss:$8 sps:$4 sm:$0xff]  }
 0x116   :  { %1949 = vmatpush2.bf16.msra.mxu0 %v1638_v59  ;;  %v3267_v59 = vld [vmem:[#allocation8 + $0x114] ss:$8 sps:$4 sm:$0xff]  }
 0x117   :  { %1908 = vmatpush2.bf16.msra.mxu1 %v3158_v58  ;;  %1950 = vmatprep.subr.bf16.mxu0 %v3168_v61  ;;  %v3228_v58 = vld [vmem:[#allocation8 + $0xe4] ss:$8 sps:$4 sm:$0xff]   ;;  %v3265_v61 = vld [vmem:[#allocation8 + $0x110] ss:$8 sps:$4 sm:$0xff]  }
 0x118   :  { %1909 = vmatprep.subr.bf16.mxu1 %v3165_v60  ;;  %v3226_v60 = vld [vmem:[#allocation8 + $0xe0] ss:$8 sps:$4 sm:$0xff]  }
 0x11a   :  { %1951 = vmatpush2.bf16.msra.mxu0 %v3166_v63  ;;  %v3270_v63 = vld [vmem:[#allocation8 + $0x104] ss:$8 sps:$4 sm:$0xff]  }
 0x11b   :  { %1910 = vmatpush2.bf16.msra.mxu1 %v3163_v62  ;;  %1952 = vmatprep.subr.bf16.mxu0 %v3174_v1  ;;  %v3231_v62 = vld [vmem:[#allocation8 + $0xd4] ss:$8 sps:$4 sm:$0xff]   ;;  %v3268_v1 = vld [vmem:[#allocation8 + $0x100] ss:$8 sps:$4 sm:$0xff]  }
 0x11c   :  { %1911 = vmatprep.subr.bf16.mxu1 %v3171_v0  ;;  %v3229_v0 = vld [vmem:[#allocation8 + $0xd0] ss:$8 sps:$4 sm:$0xff]  }
 0x11e   :  { %1953 = vmatpush2.bf16.msra.mxu0 %v3172_v3  ;;  %v3273_v3 = vld [vmem:[#allocation8 + $0x1f4] ss:$8 sps:$4 sm:$0xff]  }
 0x11f   :  { %1912 = vmatpush2.bf16.msra.mxu1 %v3169_v2  ;;  %1954 = vmatprep.subr.bf16.mxu0 %v3180_v5  ;;  %v3234_v2 = vld [vmem:[#allocation8 + $0xc4] ss:$8 sps:$4 sm:$0xff]   ;;  %v3271_v5 = vld [vmem:[#allocation8 + $0x1f0] ss:$8 sps:$4 sm:$0xff]  }
 0x120   :  { %1913 = vmatprep.subr.bf16.mxu1 %v3177_v4  ;;  %v3232_v4 = vld [vmem:[#allocation8 + $0xc0] ss:$8 sps:$4 sm:$0xff]  }
 0x122   :  { %1955 = vmatpush2.bf16.msra.mxu0 %v3178_v9  ;;  %v3276_v9 = vld [vmem:[#allocation8 + $0x1e4] ss:$8 sps:$4 sm:$0xff]  }
 0x123   :  { %1914 = vmatpush2.bf16.msra.mxu1 %v3175_v8  ;;  %1956 = vmatprep.subr.bf16.mxu0 %v3186_v11  ;;  %v3237_v8 = vld [vmem:[#allocation8 + $0xb4] ss:$8 sps:$4 sm:$0xff]   ;;  %v3274_v11 = vld [vmem:[#allocation8 + $0x1e0] ss:$8 sps:$4 sm:$0xff]  }
 0x124   :  { %1915 = vmatprep.subr.bf16.mxu1 %v3183_v10  ;;  %v3235_v10 = vld [vmem:[#allocation8 + $0xb0] ss:$8 sps:$4 sm:$0xff]  }
 0x126   :  { %1957 = vmatpush2.bf16.msra.mxu0 %v3184_v13  ;;  %v3279_v13 = vld [vmem:[#allocation8 + $0x1d4] ss:$8 sps:$4 sm:$0xff]  }
 0x127   :  { %1916 = vmatpush2.bf16.msra.mxu1 %v3181_v12  ;;  %1958 = vmatprep.subr.bf16.mxu0 %v3192_v16  ;;  %v3240_v12 = vld [vmem:[#allocation8 + $0xa4] ss:$8 sps:$4 sm:$0xff]   ;;  %v3238_v16 = vld [vmem:[#allocation8 + $0xa0] ss:$8 sps:$4 sm:$0xff]  }
 0x128   :  { %1917 = vmatprep.subr.bf16.mxu1 %v3189_v14  ;;  %v329_v14 = vlaneseq }
 0x12a   :  { %1959 = vmatpush2.bf16.msra.mxu0 %v3190_v18  ;;  %v3243_v18 = vld [vmem:[#allocation8 + $0x94] ss:$8 sps:$4 sm:$0xff]  }
 0x12b   :  { %1918 = vmatpush2.bf16.msra.mxu1 %v3187_v17  ;;  %1960 = vmatprep.subr.bf16.mxu0 %v3198_v21  ;;  %v3277_v17 = vld [vmem:[#allocation8 + $0x1d0] ss:$8 sps:$4 sm:$0xff]   ;;  %v3512_v21 = vshrl.u32 %v329_v14, 7 }
 0x12c   :  { %1919 = vmatprep.subr.bf16.mxu1 %v3195_v20  ;;  %v3282_v20 = vld [vmem:[#allocation8 + $0x1c4] ss:$8 sps:$4 sm:$0xff]  }
 0x12e   :  { %1961 = vmatpush2.bf16.msra.mxu0 %v3196_v23  ;;  %v3280_v23 = vld [vmem:[#allocation8 + $0x1c0] ss:$8 sps:$4 sm:$0xff]  }
 0x12f   :  { %1920 = vmatpush2.bf16.msra.mxu1 %v3193_v22  ;;  %2375 = vmatprep.subr.bf16.mxu0 %v3201_v24  ;;  %v3241_v22 = vld [vmem:[#allocation8 + $0x90] ss:$8 sps:$4 sm:$0xff]   ;;  %v3246_v24 = vld [vmem:[#allocation8 + $0x84] ss:$8 sps:$4 sm:$0xff]  }
 0x130   :  { %2416 = vmatprep.subr.bf16.mxu1 %v3249_v51 }
 0x131   :  { %1963 = vmatmul.mubr.bf16.vlgmr.msra.gmra.mxu0 %v3485_v15  ;;  %v3208_v15 = vld [vmem:[#allocation8 + $0x40] ss:$8 sps:$4 sm:$0xff]  }
 0x132   :  { %1922 = vmatmul.mubr.bf16.vlgmr.msra.gmra.mxu1 %v3490_v19  ;;  %2376 = vmatpush1.bf16.msra.mxu0 %v3199_v25  ;;  %v3285_v25 = vld [vmem:[#allocation8 + $0x1b4] ss:$8 sps:$4 sm:$0xff]  }
 0x133   :  { %2377 = vmatprep.subr.bf16.mxu0 %v3204_v26  ;;  %2417 = vmatpush1.bf16.msra.mxu1 %v3247_v35  ;;  %v331_v26 = vsub.s32 0, %v3512_v21 }
 0x134   :  { %2418 = vmatprep.subr.bf16.mxu1 %v3252_v38  ;;  %v3291_v38 = vld [vmem:[#allocation8 + $0x194] ss:$8 sps:$4 sm:$0xff]  }
 0x135   :  { %v3504_v29 = vpop.f32.mrf.mxu0 }
 0x136   :  { %v3506_v30 = vpop.f32.mrf.mxu1  ;;  %2378 = vmatpush1.bf16.msra.mxu0 %v3202_v27  ;;  %v327_v27 = vld [vmem:[#allocation7] sm:$0xf] }
 0x137   :  { %v3508_v32 = vpop.f32.mrf.mxu0  ;;  %2379 = vmatprep.subr.bf16.mxu0 %v3207_v28  ;;  %2419 = vmatpush1.bf16.msra.mxu1 %v3250_v31  ;;  %v335_v28 = vsub.s32 1, %v3512_v21  ;;  %v3289_v31 = vld [vmem:[#allocation8 + $0x190] ss:$8 sps:$4 sm:$0xff]  }
 0x138   :  { %v3510_v33 = vpop.f32.mrf.mxu1  ;;  %2420 = vmatprep.subr.bf16.mxu1 %v3255_v41 }
 0x139   :  { %v1681_v34 = vpop.f32.mrf.mxu0 }
 0x13a   :  { %v1722_v19 = vpop.f32.mrf.mxu1  ;;  %2380 = vmatpush1.bf16.msra.mxu0 %v3205_v47  ;;  %v3244_v47 = vld [vmem:[#allocation8 + $0x80] ss:$8 sps:$4 sm:$0xff]   ;;  %v332_v34 = vrot.slane %v327_v27, %v331_v26 }
 0x13b   :  { %v1682_v36 = vpop.f32.mrf.mxu0  ;;  %2381 = vmatprep.subr.bf16.mxu0 %v3210_v6  ;;  %2421 = vmatpush1.bf16.msra.mxu1 %v3253_v43  ;;  %v3283_v6 = vld [vmem:[#allocation8 + $0x1b0] ss:$8 sps:$4 sm:$0xff]   ;;  %v336_v19 = vrot.slane %v327_v27, %v335_v28 }
 0x13c   :  { %v1723_v37 = vpop.f32.mrf.mxu1  ;;  %2422 = vmatprep.subr.bf16.mxu1 %v3258_v45  ;;  %v1678_v36 = vadd.f32 %v3504_v29, %v332_v34  ;;  %v3294_v45 = vld [vmem:[#allocation8 + $0x184] ss:$8 sps:$4 sm:$0xff]  }
 0x13d   :  { %v3286_v37 = vld [vmem:[#allocation8 + $0x1a0] ss:$8 sps:$4 sm:$0xff]   ;;  %v1680_v35 = vadd.f32 %v3508_v32, %v336_v19 }
 0x13e   :  { %2382 = vmatpush1.bf16.msra.mxu0 %v3208_v15  ;;  %v3288_v15 = vld [vmem:[#allocation8 + $0x1a4] ss:$8 sps:$4 sm:$0xff]  }
 0x13f   :  { %2383 = vmatprep.subr.bf16.mxu0 %v3213_v7  ;;  %2423 = vmatpush1.bf16.msra.mxu1 %v3256_v48 }
 0x140   :  { %2424 = vmatprep.subr.bf16.mxu1 %v3261_v50 }
 0x142   :  { %2384 = vmatpush1.bf16.msra.mxu0 %v3211_v39  ;;  %v1719_v39 = vadd.f32 %v3506_v30, %v1678_v36  ;;  %v2043_v36 = vld [vmem:[%s3540_s4] sm:$0x3]  ;;  %s3375_s4 = scalar_lea.vmem %s2468_s16, 256 }
 0x143   :  { %2385 = vmatprep.subr.bf16.mxu0 %v3216_v40  ;;  %2425 = vmatpush1.bf16.msra.mxu1 %v3259_v53  ;;  %p3376_p6 = scmp.ne.s32.totalorder %s2468_s16, %s3375_s4  ;;  %p3381_p8 = scmp.lt.s32.totalorder %s3375_s4, %s3375_s4 }
 0x144   :  { %2426 = vmatprep.subr.bf16.mxu1 %v3264_v55 }
 0x145   :  { %p3382_p9 = por %p3381_p8, %p3380_p7 }
 0x146   :  { %2386 = vmatpush1.bf16.msra.mxu0 %v3214_v42  ;;  %v1721_v42 = vadd.f32 %v3510_v33, %v1680_v35 }
 0x147   :  { %2387 = vmatprep.subr.bf16.mxu0 %v3219_v44  ;;  %2427 = vmatpush1.bf16.msra.mxu1 %v3262_v57  ;;  %p3383_p10 = pnand %p3382_p9, %p3376_p6 }
 0x148   :  { %2428 = vmatprep.subr.bf16.mxu1 %v3267_v59 }
 0x14a   :  { %2388 = vmatpush1.bf16.msra.mxu0 %v3217_v46 }
 0x14b   :  { %2389 = vmatprep.subr.bf16.mxu0 %v3222_v49  ;;  %2429 = vmatpush1.bf16.msra.mxu1 %v3265_v61  ;;  %v3292_v49 = vld [vmem:[#allocation8 + $0x180] ss:$8 sps:$4 sm:$0xff]  }
 0x14c   :  { %2430 = vmatprep.subr.bf16.mxu1 %v3270_v63  ;;  %v339_v63 = vsub.s32 2, %v3512_v21 }
 0x14e   :  { %2390 = vmatpush1.bf16.msra.mxu0 %v3220_v52 }
 0x14f   :  { %2391 = vmatprep.subr.bf16.mxu0 %v3225_v54  ;;  %2431 = vmatpush1.bf16.msra.mxu1 %v3268_v1  ;;  %v343_v1 = vsub.s32 3, %v3512_v21 }
 0x150   :  { %2432 = vmatprep.subr.bf16.mxu1 %v3273_v3 }
 0x151   :  { %v344_v3 = vrot.slane %v327_v27, %v343_v1 }
 0x152   :  { %2392 = vmatpush2.bf16.msra.mxu0 %v3223_v56 }
 0x153   :  { %2393 = vmatprep.subr.bf16.mxu0 %v3228_v58  ;;  %2433 = vmatpush2.bf16.msra.mxu1 %v3271_v5 }
 0x154   :  { %2434 = vmatprep.subr.bf16.mxu1 %v3276_v9 }
 0x156   :  { %2394 = vmatpush2.bf16.msra.mxu0 %v3226_v60 }
 0x157   :  { %2395 = vmatprep.subr.bf16.mxu0 %v3231_v62  ;;  %2435 = vmatpush2.bf16.msra.mxu1 %v3274_v11 }
 0x158   :  { %2436 = vmatprep.subr.bf16.mxu1 %v3279_v13 }
 0x15a   :  { %2396 = vmatpush2.bf16.msra.mxu0 %v3229_v0  ;;  %v340_v0 = vrot.slane %v327_v27, %v339_v63 }
 0x15b   :  { %2397 = vmatprep.subr.bf16.mxu0 %v3234_v2  ;;  %2437 = vmatpush2.bf16.msra.mxu1 %v3277_v17 }
 0x15c   :  { %2438 = vmatprep.subr.bf16.mxu1 %v3282_v20 }
 0x15e   :  { %2398 = vmatpush2.bf16.msra.mxu0 %v3232_v4 }
 0x15f   :  { %2399 = vmatprep.subr.bf16.mxu0 %v3237_v8  ;;  %2439 = vmatpush2.bf16.msra.mxu1 %v3280_v23 }
 0x160   :  { %2440 = vmatprep.subr.bf16.mxu1 %v3285_v25 }
 0x162   :  { %2400 = vmatpush2.bf16.msra.mxu0 %v3235_v10 }
 0x163   :  { %2401 = vmatprep.subr.bf16.mxu0 %v3240_v12  ;;  %2441 = vmatpush2.bf16.msra.mxu1 %v3283_v6 }
 0x164   :  { %2442 = vmatprep.subr.bf16.mxu1 %v3288_v15 }
 0x166   :  { %2402 = vmatpush2.bf16.msra.mxu0 %v3238_v16 }
 0x167   :  { %2403 = vmatprep.subr.bf16.mxu0 %v3243_v18  ;;  %2443 = vmatpush2.bf16.msra.mxu1 %v3286_v37  ;;  %v2048_v37 = vrot.slane %v2043_v36, %v331_v26 }
 0x168   :  { %2444 = vmatprep.subr.bf16.mxu1 %v3291_v38 }
 0x16a   :  { %2404 = vmatpush2.bf16.msra.mxu0 %v3241_v22 }
 0x16b   :  { %2405 = vmatprep.subr.bf16.mxu0 %v3246_v24  ;;  %2445 = vmatpush2.bf16.msra.mxu1 %v3289_v31 }
 0x16c   :  { %2446 = vmatprep.subr.bf16.mxu1 %v3294_v45 }
 0x16e   :  { %2406 = vmatpush2.bf16.msra.mxu0 %v3244_v47 }
 0x16f   :  { %2447 = vmatpush2.bf16.msra.mxu1 %v3292_v49 }
 0x172   :  { %v1800_v7 = vpop.f32.mrf.mxu1 }
 0x174   :  { %v1802_v51 = vpop.f32.mrf.mxu1 }
 0x175   :  { %v1759_v40 = vpop.f32.mrf.mxu0 }
 0x176   :  { %v1804_v41 = vpop.f32.mrf.mxu1  ;;  %v1760_v43 = vadd.f32 %v1759_v40, %v1719_v39 }
 0x177   :  { %v1761_v44 = vpop.f32.mrf.mxu0 }
 0x178   :  { %v1805_v29 = vpop.f32.mrf.mxu1  ;;  %v1801_v46 = vadd.f32 %v1800_v7, %v1760_v43  ;;  %v1762_v48 = vadd.f32 %v1761_v44, %v1721_v42  ;;  %v2052_v7 = vrot.slane %v2043_v36, %v335_v28 }
 0x179   :  { %v1763_v32 = vpop.f32.mrf.mxu0 }
 0x17a   :  { %v1803_v50 = vadd.f32 %v1802_v51, %v1762_v48  ;;  %v1971_v52 = vmax.f32 %v1801_v46, 0.0 }
 0x17b   :  { %v1764_v30 = vpop.f32.mrf.mxu0 }
 0x17c   :  { %v1972_v53 = vmax.f32 %v1803_v50, 0.0  ;;  %v1975_v55 = vpack.c.bf16 %v1971_v52, %v1971_v52 }
 0x17e   :  { %v1976_v54 = vpack.c.bf16 %v1972_v53, %v1972_v53 }
 0x180   :  { %2407 = vmatprep.mubr.bf16.mxu0 %v1976_v54 }
 0x181   :  { %2408 = vmatmul.mubr.bf16.vlgmr.msra.gmra.mxu0 %v1975_v55 }
 0x1b2   :  { %v1841_v33 = vpop.f32.mrf.mxu1 }
 0x1b3   :  { %v1842_v2 = vadd.f32 %v1841_v33, %v340_v0 }
 0x1b4   :  { %v1843_v56 = vpop.f32.mrf.mxu1 }
 0x1b5   :  { %v1882_v58 = vpop.f32.mrf.mxu0  ;;  %v1844_v4 = vadd.f32 %v1843_v56, %v344_v3 }
 0x1b6   :  { %v1845_v57 = vpop.f32.mrf.mxu1  ;;  %v1883_v5 = vadd.f32 %v1882_v58, %v1842_v2 }
 0x1b7   :  { %v1884_v60 = vpop.f32.mrf.mxu0 }
 0x1b8   :  { %v1846_v59 = vpop.f32.mrf.mxu1  ;;  %v1885_v10 = vadd.f32 %v1884_v60, %v1844_v4 }
 0x1b9   :  { %v1886_v61 = vpop.f32.mrf.mxu0 }
 0x1bb   :  { %v1887_v62 = vpop.f32.mrf.mxu0 }
 0x1f1   :  { %v1964_v9 = vpop.f32.mrf.mxu0 }
 0x1f2   :  { %v1923_v8 = vpop.f32.mrf.mxu1 }
 0x1f3   :  { %v1924_v11 = vadd.f32 %v1923_v8, %v1883_v5  ;;  %v1966_v13 = vpop.f32.mrf.mxu0 }
 0x1f4   :  { %v1925_v12 = vpop.f32.mrf.mxu1 }
 0x1f5   :  { %v1965_v14 = vadd.f32 %v1964_v9, %v1924_v11  ;;  %v1926_v16 = vadd.f32 %v1925_v12, %v1885_v10  ;;  %v1968_v18 = vpop.f32.mrf.mxu0 }
 0x1f6   :  { %v1927_v17 = vpop.f32.mrf.mxu1 }
 0x1f7   :  { %v1967_v20 = vadd.f32 %v1966_v13, %v1926_v16  ;;  %v1973_v22 = vmax.f32 %v1965_v14, 0.0  ;;  %v1969_v24 = vpop.f32.mrf.mxu0 }
 0x1f8   :  { %v1928_v23 = vpop.f32.mrf.mxu1 }
 0x1f9   :  { %v1974_v25 = vmax.f32 %v1967_v20, 0.0  ;;  %v1977_v6 = vpack.c.bf16 %v1973_v22, %v1973_v22 }
 0x1fb   :  { %v1978_v47 = vpack.c.bf16 %v1974_v25, %v1974_v25 }
 0x1fd   :  { %2448 = vmatprep.mubr.bf16.mxu1 %v1978_v47 }
 0x1fe   :  { %2449 = vmatmul.mubr.bf16.vlgmr.msra.gmra.mxu1 %v1977_v6 }
 0x241   :  { %v2409_v27 = vpop.f32.mrf.mxu0 }
 0x242   :  { %v2410_v35 = vadd.f32 %v2409_v27, %v2048_v37 }
 0x243   :  { %v2411_v34 = vpop.f32.mrf.mxu0 }
 0x244   :  { %v2412_v38 = vadd.f32 %v2411_v34, %v2052_v7 }
 0x245   :  { %v2413_v19 = vpop.f32.mrf.mxu0 }
 0x247   :  { %v2414_v15 = vpop.f32.mrf.mxu0 }
 0x2be   :  { %v2450_v51 = vpop.f32.mrf.mxu1 }
 0x2bf   :  { %v2451_v39 = vadd.f32 %v2450_v51, %v2410_v35 }
 0x2c0   :  { %v2452_v31 = vpop.f32.mrf.mxu1 }
 0x2c1   :  { %v2457_v40 = vmax.f32 %v2451_v39, 0.0  ;;  %v2453_v41 = vadd.f32 %v2452_v31, %v2412_v38 }
 0x2c2   :  { %v2454_v42 = vpop.f32.mrf.mxu1 }
 0x2c3   :  { %2459 = vst [vmem:[#allocation10] sm:$0xff] %v2457_v40  ;;  %v2458_v43 = vmax.f32 %v2453_v41, 0.0 }
 0x2c4   :  { %v2455_v44 = vpop.f32.mrf.mxu1 }
 0x2c5   :  { %2460 = vst [vmem:[#allocation10 + $0x8] sm:$0xff] %v2458_v43 }
 0x2c6   :  { %3386 = shalt.err (!%p3383_p10)
}
 0x2c7   :  { %2470 = dma.vmem_to_hbm [thread:$0]  %s2468_s16, 256, %s3541_s5, [#allocation4]  }
 0x2c8   :  { %3401 = dma.done.wait [#allocation4], 256  }
 0x2c9   :  { %3402 = vsyncadd [#allocation4], 4294967040 }
 0x2ca   :  { %2474 = vsyncpa [#allocation3], 1 }
 0x2cb   :  { %2475 = vsyncpa [#allocation6], 1 }
 0x2cc   :  { %2476 = vsyncpa [#allocation9], 1 }
 0x2cd   :  { %2477 = vsyncpa [#allocation4], 1 }

</bundles_post_ra>
